<compile_context>
chip_gen: v6e
topology: v6e:2x2x1
jax: 0.10.0
libtpu: 0.0.40
codegen_flags: <defaults>
</compile_context>

<pallas_src>
import functools

import jax
import jax.numpy as jnp
from jax.experimental import pallas as pl
from jax.experimental.pallas import tpu as pltpu


def _round_up(n, m):
    return ((n + m - 1) // m) * m


def _mlp_kernel(x_ref, *refs, num_layers, activation, matmul_dtype):
    """Whole-MLP forward for one batch tile.

    refs = (w0, b0, w1, b1, ..., w_{L-1}, b_{L-1}, out_ref)
    Hidden layers use `activation` (tanh or relu); last layer uses sigmoid.
    All shapes are already padded to 128-lane multiples by the wrapper.
    """
    out_ref = refs[-1]
    param_refs = refs[:-1]

    h = x_ref[...].astype(jnp.float32)
    for i in range(num_layers):
        w = param_refs[2 * i][...]                           # (in_p, out_p)
        b = param_refs[2 * i + 1][...].astype(jnp.float32)   # (1, out_p)
        # MXU matmul: optionally bf16 inputs (v6e/v7x fast path), f32 accumulate.
        z = jnp.dot(
            h.astype(matmul_dtype),
            w.astype(matmul_dtype),
            preferred_element_type=jnp.float32,
        ) + b
        if i < num_layers - 1:
            # Keep activation math in f32 (v5e VPU/EUP have no bf16 path).
            h = jnp.maximum(z, 0.0) if activation == "relu" else jnp.tanh(z)
        else:
            h = jax.nn.sigmoid(z)
    out_ref[...] = h.astype(out_ref.dtype)


def committor_net_forward(
    x,
    params,
    *,
    activation="tanh",
    tile_b=256,                 # use 128 on v5e if VMEM-pressured; 256 fills v6e/v7x MXU
    matmul_dtype=jnp.float32,   # jnp.bfloat16 for the v6e/v7x MXU fast path
    lane=128,
):
    """params: list of (W, b) with W shape (in, out), b shape (1, out) or (out,)."""
    B, D = x.shape
    output_dim = params[-1][0].shape[1]
    num_layers = len(params)

    # ---- pad batch to a tile multiple and all feature dims to 128 lanes ----
    Bp = _round_up(max(B, 1), tile_b)
    padded_dims = [_round_up(D, lane)]
    for w, _ in params:
        padded_dims.append(_round_up(w.shape[1], lane))
    p_out = padded_dims[-1]

    x_p = jnp.pad(x, ((0, Bp - B), (0, padded_dims[0] - D)))

    flat_params = []
    for i, (w, b) in enumerate(params):
        win, wout = w.shape
        w_p = jnp.pad(w, ((0, padded_dims[i] - win), (0, padded_dims[i + 1] - wout)))
        b_p = jnp.pad(b.reshape(1, -1), ((0, 0), (0, padded_dims[i + 1] - wout)))
        flat_params += [w_p, b_p]

    # x / out tiled over batch; weights & biases fully resident in VMEM
    # (block index never changes -> no double-buffering, no index_map closures).
    in_specs = [pl.BlockSpec((tile_b, padded_dims[0]), lambda i: (i, 0))]
    in_specs += [
        pl.BlockSpec(memory_space=pltpu.MemorySpace.VMEM) for _ in flat_params
    ]
    out_spec = pl.BlockSpec((tile_b, p_out), lambda i: (i, 0))  # lane-dense output

    kernel = functools.partial(
        _mlp_kernel,
        num_layers=num_layers,
        activation=activation,
        matmul_dtype=matmul_dtype,
    )

    out_padded = pl.pallas_call(
        kernel,
        out_shape=jax.ShapeDtypeStruct((Bp, p_out), x.dtype),
        grid_spec=pltpu.PrefetchScalarGridSpec(
            num_scalar_prefetch=0,
            grid=(pl.cdiv(Bp, tile_b),),
            in_specs=in_specs,
            out_specs=out_spec,
        ),
        compiler_params=pltpu.CompilerParams(
            dimension_semantics=("parallel",),
        ),
    )(x_p, *flat_params)

    # Drop batch padding and the padded output lanes (only column 0 is real).
    return out_padded[:B, :output_dim]


def init_params(key, input_dim, hidden_size, num_hidden_layers, output_dim=1):
    """Xavier-uniform weights, zero biases (matches CommittorNet.initialize_weights).

    Layer structure mirrors the PyTorch module:
      Linear(in, h), [Linear(h, h)] * (num_hidden_layers - 1), Linear(h, out).
    """
    dims = [input_dim] + [hidden_size] * num_hidden_layers + [output_dim]
    params = []
    for i in range(len(dims) - 1):
        key, sub = jax.random.split(key)
        fan_in, fan_out = dims[i], dims[i + 1]
        limit = jnp.sqrt(6.0 / (fan_in + fan_out))
        w = jax.random.uniform(
            sub, (fan_in, fan_out), minval=-limit, maxval=limit, dtype=jnp.float32
        )
        b = jnp.zeros((1, fan_out), dtype=jnp.float32)
        params.append((w, b))
    return params


def reference_forward(x, params, activation="tanh"):
    h = x
    for i, (w, b) in enumerate(params):
        h = h @ w + b
        if i < len(params) - 1:
            h = jnp.maximum(h, 0.0) if activation == "relu" else jnp.tanh(h)
        else:
            h = jax.nn.sigmoid(h)
    return h


if __name__ == "__main__":
    # Shapes consistent with the module's forward: x is (batch, input_dim).
    input_dim = 16
    hidden_size = 32
    num_hidden_layers = 3
    output_dim = 1
    batch = 200  # deliberately NOT a multiple of tile_b to exercise the padding path

    key = jax.random.PRNGKey(0)
    key, xkey = jax.random.split(key)
    x = jax.random.normal(xkey, (batch, input_dim), dtype=jnp.float32)
    params = init_params(key, input_dim, hidden_size, num_hidden_layers, output_dim)

    ref = reference_forward(x, params, activation="tanh")

    # f32 matmul path (exact vs reference).
    out = committor_net_forward(x, params, activation="tanh", tile_b=256)
    out = jax.block_until_ready(out)
    assert out.shape == (batch, output_dim)
    assert jnp.allclose(out, ref, atol=1e-5, rtol=1e-5)

    # bf16-matmul fast path (v6e/v7x MXU) — looser tolerance.
    out_bf16 = committor_net_forward(
        x, params, activation="tanh", tile_b=256, matmul_dtype=jnp.bfloat16
    )
    out_bf16 = jax.block_until_ready(out_bf16)
    assert out_bf16.shape == (batch, output_dim)
    assert jnp.allclose(out_bf16, ref, atol=5e-2, rtol=5e-2)

    print("KERNEL_OK")
</pallas_src>

<mosaic_0001>
module attributes {stable_mosaic.version = 11 : i64} {
  func.func @_mlp_kernel(%arg0: i32, %arg1: memref<256x128xf32, #tpu.memory_space<vmem>>, %arg2: memref<128x128xf32, #tpu.memory_space<vmem>>, %arg3: memref<1x128xf32, #tpu.memory_space<vmem>>, %arg4: memref<128x128xf32, #tpu.memory_space<vmem>>, %arg5: memref<1x128xf32, #tpu.memory_space<vmem>>, %arg6: memref<128x128xf32, #tpu.memory_space<vmem>>, %arg7: memref<1x128xf32, #tpu.memory_space<vmem>>, %arg8: memref<128x128xf32, #tpu.memory_space<vmem>>, %arg9: memref<1x128xf32, #tpu.memory_space<vmem>>, %arg10: memref<256x128xf32, #tpu.memory_space<vmem>>) attributes {dimension_semantics = [#tpu.dimension_semantics<parallel>], iteration_bounds = array<i64: 1>, scalar_prefetch = 0 : i64, scratch_operands = 0 : i64, tpu.core_type = #tpu.core_type<tc>, window_params = [{transform_indices = @transform_0, window_bounds = array<i64: 256, 128>}, {pipeline_mode = #tpu.pipeline_mode<synchronous>, transform_indices = @transform_1, window_bounds = array<i64: 128, 128>}, {pipeline_mode = #tpu.pipeline_mode<synchronous>, transform_indices = @transform_2, window_bounds = array<i64: 1, 128>}, {pipeline_mode = #tpu.pipeline_mode<synchronous>, transform_indices = @transform_3, window_bounds = array<i64: 128, 128>}, {pipeline_mode = #tpu.pipeline_mode<synchronous>, transform_indices = @transform_4, window_bounds = array<i64: 1, 128>}, {pipeline_mode = #tpu.pipeline_mode<synchronous>, transform_indices = @transform_5, window_bounds = array<i64: 128, 128>}, {pipeline_mode = #tpu.pipeline_mode<synchronous>, transform_indices = @transform_6, window_bounds = array<i64: 1, 128>}, {pipeline_mode = #tpu.pipeline_mode<synchronous>, transform_indices = @transform_7, window_bounds = array<i64: 128, 128>}, {pipeline_mode = #tpu.pipeline_mode<synchronous>, transform_indices = @transform_8, window_bounds = array<i64: 1, 128>}, {transform_indices = @transform_9, window_bounds = array<i64: 256, 128>}]} {
    %c0 = arith.constant 0 : index
    %c0_0 = arith.constant 0 : index
    %0 = vector.load %arg1[%c0, %c0_0] : memref<256x128xf32, #tpu.memory_space<vmem>>, vector<256x128xf32>
    %c0_1 = arith.constant 0 : index
    %c0_2 = arith.constant 0 : index
    %1 = vector.load %arg2[%c0_1, %c0_2] : memref<128x128xf32, #tpu.memory_space<vmem>>, vector<128x128xf32>
    %c0_3 = arith.constant 0 : index
    %c0_4 = arith.constant 0 : index
    %2 = vector.load %arg3[%c0_3, %c0_4] : memref<1x128xf32, #tpu.memory_space<vmem>>, vector<1x128xf32>
    %cst = arith.constant dense<0.000000e+00> : vector<256x128xf32>
    %3 = tpu.matmul %0, %1, %cst {dimension_numbers = #tpu.dot_dimension_numbers<[1], [0], [0], [1], [0, 0, 1, 1], [], []>} : vector<256x128xf32>, vector<128x128xf32>, vector<256x128xf32> -> vector<256x128xf32>
    %4 = vector.broadcast %2 : vector<1x128xf32> to vector<256x128xf32>
    %5 = arith.addf %3, %4 : vector<256x128xf32>
    %6 = math.tanh %5 : vector<256x128xf32>
    %c0_5 = arith.constant 0 : index
    %c0_6 = arith.constant 0 : index
    %7 = vector.load %arg4[%c0_5, %c0_6] : memref<128x128xf32, #tpu.memory_space<vmem>>, vector<128x128xf32>
    %c0_7 = arith.constant 0 : index
    %c0_8 = arith.constant 0 : index
    %8 = vector.load %arg5[%c0_7, %c0_8] : memref<1x128xf32, #tpu.memory_space<vmem>>, vector<1x128xf32>
    %cst_9 = arith.constant dense<0.000000e+00> : vector<256x128xf32>
    %9 = tpu.matmul %6, %7, %cst_9 {dimension_numbers = #tpu.dot_dimension_numbers<[1], [0], [0], [1], [0, 0, 1, 1], [], []>} : vector<256x128xf32>, vector<128x128xf32>, vector<256x128xf32> -> vector<256x128xf32>
    %10 = vector.broadcast %8 : vector<1x128xf32> to vector<256x128xf32>
    %11 = arith.addf %9, %10 : vector<256x128xf32>
    %12 = math.tanh %11 : vector<256x128xf32>
    %c0_10 = arith.constant 0 : index
    %c0_11 = arith.constant 0 : index
    %13 = vector.load %arg6[%c0_10, %c0_11] : memref<128x128xf32, #tpu.memory_space<vmem>>, vector<128x128xf32>
    %c0_12 = arith.constant 0 : index
    %c0_13 = arith.constant 0 : index
    %14 = vector.load %arg7[%c0_12, %c0_13] : memref<1x128xf32, #tpu.memory_space<vmem>>, vector<1x128xf32>
    %cst_14 = arith.constant dense<0.000000e+00> : vector<256x128xf32>
    %15 = tpu.matmul %12, %13, %cst_14 {dimension_numbers = #tpu.dot_dimension_numbers<[1], [0], [0], [1], [0, 0, 1, 1], [], []>} : vector<256x128xf32>, vector<128x128xf32>, vector<256x128xf32> -> vector<256x128xf32>
    %16 = vector.broadcast %14 : vector<1x128xf32> to vector<256x128xf32>
    %17 = arith.addf %15, %16 : vector<256x128xf32>
    %18 = math.tanh %17 : vector<256x128xf32>
    %c0_15 = arith.constant 0 : index
    %c0_16 = arith.constant 0 : index
    %19 = vector.load %arg8[%c0_15, %c0_16] : memref<128x128xf32, #tpu.memory_space<vmem>>, vector<128x128xf32>
    %c0_17 = arith.constant 0 : index
    %c0_18 = arith.constant 0 : index
    %20 = vector.load %arg9[%c0_17, %c0_18] : memref<1x128xf32, #tpu.memory_space<vmem>>, vector<1x128xf32>
    %cst_19 = arith.constant dense<0.000000e+00> : vector<256x128xf32>
    %21 = tpu.matmul %18, %19, %cst_19 {dimension_numbers = #tpu.dot_dimension_numbers<[1], [0], [0], [1], [0, 0, 1, 1], [], []>} : vector<256x128xf32>, vector<128x128xf32>, vector<256x128xf32> -> vector<256x128xf32>
    %22 = vector.broadcast %20 : vector<1x128xf32> to vector<256x128xf32>
    %23 = arith.addf %21, %22 : vector<256x128xf32>
    %24 = arith.negf %23 : vector<256x128xf32>
    %25 = math.exp %24 : vector<256x128xf32>
    %cst_20 = arith.constant 1.000000e+00 : f32
    %26 = vector.broadcast %cst_20 : f32 to vector<256x128xf32>
    %27 = arith.addf %26, %25 : vector<256x128xf32>
    %28 = arith.divf %26, %27 : vector<256x128xf32>
    %c0_21 = arith.constant 0 : index
    %c0_22 = arith.constant 0 : index
    %29 = vector.load %arg10[%c0_21, %c0_22] : memref<256x128xf32, #tpu.memory_space<vmem>>, vector<256x128xf32>
    tpu.vector_store %arg10[%c0_21, %c0_22], %28 {strides = array<i32>} : memref<256x128xf32, #tpu.memory_space<vmem>>, vector<256x128xf32>,
    return
  }
  func.func @transform_0(%arg0: i32) -> (i32, i32) {
    %c0_i32 = arith.constant 0 : i32
    %c0_i32_0 = arith.constant 0 : i32
    return %arg0, %c0_i32 : i32, i32
  }
  func.func @transform_1(%arg0: i32) -> (i32, i32) {
    %c0_i32 = arith.constant 0 : i32
    %c0_i32_0 = arith.constant 0 : i32
    %c0_i32_1 = arith.constant 0 : i32
    return %c0_i32, %c0_i32_0 : i32, i32
  }
  func.func @transform_2(%arg0: i32) -> (i32, i32) {
    %c0_i32 = arith.constant 0 : i32
    %c0_i32_0 = arith.constant 0 : i32
    %c0_i32_1 = arith.constant 0 : i32
    return %c0_i32, %c0_i32_0 : i32, i32
  }
  func.func @transform_3(%arg0: i32) -> (i32, i32) {
    %c0_i32 = arith.constant 0 : i32
    %c0_i32_0 = arith.constant 0 : i32
    %c0_i32_1 = arith.constant 0 : i32
    return %c0_i32, %c0_i32_0 : i32, i32
  }
  func.func @transform_4(%arg0: i32) -> (i32, i32) {
    %c0_i32 = arith.constant 0 : i32
    %c0_i32_0 = arith.constant 0 : i32
    %c0_i32_1 = arith.constant 0 : i32
    return %c0_i32, %c0_i32_0 : i32, i32
  }
  func.func @transform_5(%arg0: i32) -> (i32, i32) {
    %c0_i32 = arith.constant 0 : i32
    %c0_i32_0 = arith.constant 0 : i32
    %c0_i32_1 = arith.constant 0 : i32
    return %c0_i32, %c0_i32_0 : i32, i32
  }
  func.func @transform_6(%arg0: i32) -> (i32, i32) {
    %c0_i32 = arith.constant 0 : i32
    %c0_i32_0 = arith.constant 0 : i32
    %c0_i32_1 = arith.constant 0 : i32
    return %c0_i32, %c0_i32_0 : i32, i32
  }
  func.func @transform_7(%arg0: i32) -> (i32, i32) {
    %c0_i32 = arith.constant 0 : i32
    %c0_i32_0 = arith.constant 0 : i32
    %c0_i32_1 = arith.constant 0 : i32
    return %c0_i32, %c0_i32_0 : i32, i32
  }
  func.func @transform_8(%arg0: i32) -> (i32, i32) {
    %c0_i32 = arith.constant 0 : i32
    %c0_i32_0 = arith.constant 0 : i32
    %c0_i32_1 = arith.constant 0 : i32
    return %c0_i32, %c0_i32_0 : i32, i32
  }
  func.func @transform_9(%arg0: i32) -> (i32, i32) {
    %c0_i32 = arith.constant 0 : i32
    %c0_i32_0 = arith.constant 0 : i32
    return %arg0, %c0_i32 : i32, i32
  }
}

</mosaic_0001>

<bundles_post_ra>
// kernel: tpu_custom_call.1
= control target key start
LH: loop header
LB: loop body
LE: loop exit
PB: predicated region body
PF: predicated region fallthrough
CT: control target
= control target key end

     0   :  { %14 = vsyncpa [#allocation3], 0  ;;  %s2710_s0 = inlined_call_operand.hbm [shape: f32[256,128], index: 0, kind: input, shape index: {}]   ;;  %s2711_s1 = inlined_call_operand.hbm [shape: f32[128,128], index: 1, kind: input, shape index: {}]   ;;  %s2712_s2 = inlined_call_operand.vmem [shape: f32[1,128], index: 2, kind: input, shape index: {}]   ;;  %s2713_s3 = inlined_call_operand.hbm [shape: f32[128,128], index: 3, kind: input, shape index: {}]   ;;  %s2714_s4 = inlined_call_operand.vmem [shape: f32[1,128], index: 4, kind: input, shape index: {}]   ;;  %s2715_s5 = inlined_call_operand.hbm [shape: f32[128,128], index: 5, kind: input, shape index: {}]   ;;  %s2716_s6 = inlined_call_operand.vmem [shape: f32[1,128], index: 6, kind: input, shape index: {}]   ;;  %s2717_s7 = inlined_call_operand.hbm [shape: f32[128,128], index: 7, kind: input, shape index: {}]   ;;  %s2718_s8 = inlined_call_operand.vmem [shape: f32[1,128], index: 8, kind: input, shape index: {}]   ;;  %s2719_s9 = inlined_call_operand.hbm [shape: f32[256,128], index: 9, kind: output, shape index: {}]  }
   0x1   :  { %15 = vsyncpa [#allocation6], 0 }
   0x2   :  { %16 = vsyncpa [#allocation9], 0 }
   0x3   :  { %17 = vsyncpa [#allocation4], 0  ;;  %s2468_s30 = smov [#allocation5]   ;;  %s2469_s11 = smov [#allocation8]  }
   0x4   :  { %s35_s10 = sshll.u32 %s2468_s30, 4  ;;  %s63_s12 = sshll.u32 %s2469_s11, 4  ;;  %s36_s10 = int_to_ptr.vmem [resolvable:$true] %s35_s10  ;;  %s64_s12 = int_to_ptr.vmem [resolvable:$true] %s63_s12 }
   0x5   :  { %s2348_s13 = scalar_lea.vmem %s36_s10, 2048  ;;  %p2353_p1 = scmp.lt.s32.totalorder %s36_s10, %s36_s10 }
   0x6   :  { %p2349_p0 = scmp.ne.s32.totalorder %s36_s10, %s2348_s13  ;;  %p2354_p2 = scmp.lt.s32.totalorder %s2348_s13, %s2348_s13 }
   0x8   :  { %p2355_p3 = por %p2354_p2, %p2353_p1 }
   0xa   :  { %p2356_p4 = pnand %p2355_p3, %p2349_p0 }
   0xc   :  { %2359 = shalt.err (!%p2356_p4)
}
   0xd   :  { %s2470_s14 = smov 128   ;;  %s2471_s15 = smov 8  }
   0xe   :  { %41 = dma.hbm_to_vmem [thread:$0]  %s2711_s1, 2048, %s36_s10, [#allocation6], %s2470_s14, %s2470_s14, %s2471_s15  }
   0xf   :  { %s2368_s18 = scalar_lea.vmem %s64_s12, 2048  ;;  %p2373_p6 = scmp.lt.s32.totalorder %s64_s12, %s64_s12 }
  0x10   :  { %p2369_p5 = scmp.ne.s32.totalorder %s64_s12, %s2368_s18  ;;  %p2374_p7 = scmp.lt.s32.totalorder %s2368_s18, %s2368_s18 }
  0x12   :  { %p2375_p8 = por %p2374_p7, %p2373_p6 }
  0x14   :  { %p2376_p9 = pnand %p2375_p8, %p2369_p5 }
  0x16   :  { %2379 = shalt.err (!%p2376_p9)
}
  0x17   :  { %69 = dma.hbm_to_vmem [thread:$0]  %s2715_s5, 2048, %s64_s12, [#allocation9], %s2470_s14, %s2470_s14, %s2471_s15  }
  0x18   :  { %s2472_s21 = smov [#allocation2]   ;;  %s2473_s23 = smov [#allocation7]  }
  0x19   :  { %s23_s22 = sshll.u32 %s2472_s21, 4  ;;  %s49_s24 = sshll.u32 %s2473_s23, 4  ;;  %s24_s22 = int_to_ptr.vmem [resolvable:$true] %s23_s22  ;;  %s50_s24 = int_to_ptr.vmem [resolvable:$true] %s49_s24 }
  0x1a   :  { %s2388_s1 = scalar_lea.vmem %s24_s22, 4096  ;;  %p2393_p11 = scmp.lt.s32.totalorder %s24_s22, %s24_s22 }
  0x1b   :  { %p2389_p10 = scmp.ne.s32.totalorder %s24_s22, %s2388_s1  ;;  %p2394_p12 = scmp.lt.s32.totalorder %s2388_s1, %s2388_s1 }
  0x1d   :  { %p2395_p13 = por %p2394_p12, %p2393_p11 }
  0x1f   :  { %p2396_p0 = pnand %p2395_p13, %p2389_p10 }
  0x21   :  { %2399 = shalt.err (!%p2396_p0)
}
  0x22   :  { %29 = dma.hbm_to_vmem [thread:$0]  %s2710_s0, 4096, %s24_s22, [#allocation3], %s2470_s14, %s2470_s14, %s2471_s15  }
  0x23   :  { %s2408_s5 = scalar_lea.vmem %s50_s24, 2048  ;;  %p2413_p2 = scmp.lt.s32.totalorder %s50_s24, %s50_s24 }
  0x24   :  { %p2409_p1 = scmp.ne.s32.totalorder %s50_s24, %s2408_s5  ;;  %p2414_p3 = scmp.lt.s32.totalorder %s2408_s5, %s2408_s5 }
  0x26   :  { %p2415_p4 = por %p2414_p3, %p2413_p2 }
  0x28   :  { %p2416_p5 = pnand %p2415_p4, %p2409_p1 }
  0x2a   :  { %2419 = shalt.err (!%p2416_p5)
}
  0x2b   :  { %55 = dma.hbm_to_vmem [thread:$0]  %s2713_s3, 2048, %s50_s24, [#allocation6], %s2470_s14, %s2470_s14, %s2471_s15  }
  0x2c   :  { %s2474_s29 = smov [#allocation10]  }
  0x2d   :  { %s77_s30 = sshll.u32 %s2474_s29, 4  ;;  %s78_s30 = int_to_ptr.vmem [resolvable:$true] %s77_s30 }
  0x2e   :  { %s2428_s10 = scalar_lea.vmem %s78_s30, 2048  ;;  %p2433_p7 = scmp.lt.s32.totalorder %s78_s30, %s78_s30 }
  0x2f   :  { %p2429_p6 = scmp.ne.s32.totalorder %s78_s30, %s2428_s10  ;;  %p2434_p8 = scmp.lt.s32.totalorder %s2428_s10, %s2428_s10 }
  0x31   :  { %p2435_p9 = por %p2434_p8, %p2433_p7 }
  0x33   :  { %p2436_p10 = pnand %p2435_p9, %p2429_p6 }
  0x35   :  { %2439 = shalt.err (!%p2436_p10)
}
  0x36   :  { %83 = dma.hbm_to_vmem [thread:$0]  %s2717_s7, 2048, %s78_s30, [#allocation9], %s2470_s14, %s2470_s14, %s2471_s15  }
  0x37   :  { %2460 = dma.done.wait [#allocation3], 4096  }
  0x38   :  { %2461 = vsyncadd [#allocation3], 4294963200 }
  0x39   :  { %2462 = dma.done.wait [#allocation6], 4096  }
  0x3a   :  { %2463 = vsyncadd [#allocation6], 4294963200 }
  0x3b   :  { %2464 = dma.done.wait [#allocation9], 4096  }
  0x3c   :  { %2465 = vsyncadd [#allocation9], 4294963200  ;;  %v148_v0 = vld [vmem:[#allocation5 + $0x78] sm:$0xff]  ;;  %v147_v1 = vld [vmem:[#allocation5 + $0x70] sm:$0xff] }
  0x3d   :  { %1692 = vmatprep.subr.mxu0 %v148_v0  ;;  %v146_v2 = vld [vmem:[#allocation5 + $0x68] sm:$0xff]  ;;  %v145_v3 = vld [vmem:[#allocation5 + $0x60] sm:$0xff]  ;;  %v144_v5 = vld [vmem:[#allocation5 + $0x58] sm:$0xff] }
  0x3e   :  { %1693 = vmatpush3.msra.mxu0 %v148_v0  ;;  %v101_v4 = vld [vmem:[#allocation2] sm:$0xff]  ;;  %v143_v6 = vld [vmem:[#allocation5 + $0x50] sm:$0xff]  ;;  %v142_v7 = vld [vmem:[#allocation5 + $0x48] sm:$0xff] }
  0x3f   :  { %1694 = vmatprep.subr.mxu0 %v147_v1  ;;  %1724 = vmatprep.mubr.f32.mxu0 %v101_v4  ;;  %v141_v8 = vld [vmem:[#allocation5 + $0x40] sm:$0xff]  ;;  %v140_v9 = vld [vmem:[#allocation5 + $0x38] sm:$0xff]  ;;  %v139_v10 = vld [vmem:[#allocation5 + $0x30] sm:$0xff] }
  0x40   :  { %1695 = vmatpush3.msra.mxu0 %v147_v1  ;;  %v428_v11 = vld [vmem:[#allocation7 + $0x78] sm:$0xff]  ;;  %v427_v12 = vld [vmem:[#allocation7 + $0x70] sm:$0xff]  ;;  %v138_v13 = vld [vmem:[#allocation5 + $0x28] sm:$0xff] }
  0x41   :  { %1696 = vmatprep.subr.mxu0 %v146_v2  ;;  %1772 = vmatprep.subr.mxu1 %v428_v11  ;;  %v426_v14 = vld [vmem:[#allocation7 + $0x68] sm:$0xff]  ;;  %v137_v15 = vld [vmem:[#allocation5 + $0x20] sm:$0xff]  ;;  %v136_v17 = vld [vmem:[#allocation5 + $0x18] sm:$0xff] }
  0x42   :  { %1697 = vmatpush3.msra.mxu0 %v146_v2  ;;  %1773 = vmatpush3.msra.mxu1 %v428_v11  ;;  %v425_v16 = vld [vmem:[#allocation7 + $0x60] sm:$0xff]  ;;  %v424_v18 = vld [vmem:[#allocation7 + $0x58] sm:$0xff]  ;;  %v135_v19 = vld [vmem:[#allocation5 + $0x10] sm:$0xff] }
  0x43   :  { %1698 = vmatprep.subr.mxu0 %v145_v3  ;;  %1774 = vmatprep.subr.mxu1 %v427_v12  ;;  %v423_v20 = vld [vmem:[#allocation7 + $0x50] sm:$0xff]  ;;  %v134_v21 = vld [vmem:[#allocation5 + $0x8] sm:$0xff]  ;;  %v133_v22 = vld [vmem:[#allocation5] sm:$0xff] }
  0x44   :  { %1699 = vmatpush3.msra.mxu0 %v145_v3  ;;  %1775 = vmatpush3.msra.mxu1 %v427_v12  ;;  %v102_v23 = vld [vmem:[#allocation2 + $0x8] sm:$0xff]  ;;  %v103_v24 = vld [vmem:[#allocation2 + $0x10] sm:$0xff]  ;;  %v104_v25 = vld [vmem:[#allocation2 + $0x18] sm:$0xff] }
  0x45   :  { %1700 = vmatprep.subr.mxu0 %v144_v5  ;;  %1776 = vmatprep.subr.mxu1 %v426_v14  ;;  %v105_v26 = vld [vmem:[#allocation2 + $0x20] sm:$0xff]  ;;  %v106_v27 = vld [vmem:[#allocation2 + $0x28] sm:$0xff]  ;;  %v107_v28 = vld [vmem:[#allocation2 + $0x30] sm:$0xff] }
  0x46   :  { %1701 = vmatpush3.msra.mxu0 %v144_v5  ;;  %1777 = vmatpush3.msra.mxu1 %v426_v14  ;;  %v108_v29 = vld [vmem:[#allocation2 + $0x38] sm:$0xff]  ;;  %v109_v30 = vld [vmem:[#allocation2 + $0x40] sm:$0xff]  ;;  %v110_v31 = vld [vmem:[#allocation2 + $0x48] sm:$0xff] }
  0x47   :  { %1702 = vmatprep.subr.mxu0 %v143_v6  ;;  %1778 = vmatprep.subr.mxu1 %v425_v16  ;;  %v111_v32 = vld [vmem:[#allocation2 + $0x50] sm:$0xff]  ;;  %v112_v33 = vld [vmem:[#allocation2 + $0x58] sm:$0xff]  ;;  %v113_v34 = vld [vmem:[#allocation2 + $0x60] sm:$0xff] }
  0x48   :  { %1703 = vmatpush3.msra.mxu0 %v143_v6  ;;  %1779 = vmatpush3.msra.mxu1 %v425_v16  ;;  %v114_v35 = vld [vmem:[#allocation2 + $0x68] sm:$0xff]  ;;  %v115_v36 = vld [vmem:[#allocation2 + $0x70] sm:$0xff]  ;;  %v116_v37 = vld [vmem:[#allocation2 + $0x78] sm:$0xff] }
  0x49   :  { %1704 = vmatprep.subr.mxu0 %v142_v7  ;;  %1780 = vmatprep.subr.mxu1 %v424_v18  ;;  %v117_v38 = vld [vmem:[#allocation2 + $0x80] sm:$0xff]  ;;  %v118_v39 = vld [vmem:[#allocation2 + $0x88] sm:$0xff]  ;;  %v119_v40 = vld [vmem:[#allocation2 + $0x90] sm:$0xff] }
  0x4a   :  { %1705 = vmatpush3.msra.mxu0 %v142_v7  ;;  %1781 = vmatpush3.msra.mxu1 %v424_v18  ;;  %v120_v41 = vld [vmem:[#allocation2 + $0x98] sm:$0xff]  ;;  %v121_v42 = vld [vmem:[#allocation2 + $0xa0] sm:$0xff]  ;;  %v122_v43 = vld [vmem:[#allocation2 + $0xa8] sm:$0xff] }
  0x4b   :  { %1706 = vmatprep.subr.mxu0 %v141_v8  ;;  %1782 = vmatprep.subr.mxu1 %v423_v20  ;;  %v123_v44 = vld [vmem:[#allocation2 + $0xb0] sm:$0xff]  ;;  %v124_v45 = vld [vmem:[#allocation2 + $0xb8] sm:$0xff]  ;;  %v125_v46 = vld [vmem:[#allocation2 + $0xc0] sm:$0xff] }
  0x4c   :  { %1707 = vmatpush3.msra.mxu0 %v141_v8  ;;  %1783 = vmatpush3.msra.mxu1 %v423_v20  ;;  %v126_v47 = vld [vmem:[#allocation2 + $0xc8] sm:$0xff]  ;;  %v127_v48 = vld [vmem:[#allocation2 + $0xd0] sm:$0xff]  ;;  %v128_v49 = vld [vmem:[#allocation2 + $0xd8] sm:$0xff] }
  0x4d   :  { %1708 = vmatprep.subr.mxu0 %v140_v9  ;;  %v129_v50 = vld [vmem:[#allocation2 + $0xe0] sm:$0xff]  ;;  %v130_v51 = vld [vmem:[#allocation2 + $0xe8] sm:$0xff]  ;;  %v131_v52 = vld [vmem:[#allocation2 + $0xf0] sm:$0xff] }
  0x4e   :  { %1709 = vmatpush3.msra.mxu0 %v140_v9  ;;  %v132_v53 = vld [vmem:[#allocation2 + $0xf8] sm:$0xff]  ;;  %v422_v54 = vld [vmem:[#allocation7 + $0x48] sm:$0xff]  ;;  %v421_v55 = vld [vmem:[#allocation7 + $0x40] sm:$0xff] }
  0x4f   :  { %1710 = vmatprep.subr.mxu0 %v139_v10  ;;  %1784 = vmatprep.subr.mxu1 %v422_v54  ;;  %v420_v56 = vld [vmem:[#allocation7 + $0x38] sm:$0xff]  ;;  %v419_v57 = vld [vmem:[#allocation7 + $0x30] sm:$0xff]  ;;  %v418_v58 = vld [vmem:[#allocation7 + $0x28] sm:$0xff] }
  0x50   :  { %1711 = vmatpush3.msra.mxu0 %v139_v10  ;;  %1785 = vmatpush3.msra.mxu1 %v422_v54  ;;  %v417_v59 = vld [vmem:[#allocation7 + $0x20] sm:$0xff]  ;;  %v416_v60 = vld [vmem:[#allocation7 + $0x18] sm:$0xff]  ;;  %v415_v61 = vld [vmem:[#allocation7 + $0x10] sm:$0xff] }
  0x51   :  { %1712 = vmatprep.subr.mxu0 %v138_v13  ;;  %1786 = vmatprep.subr.mxu1 %v421_v55  ;;  %v414_v62 = vld [vmem:[#allocation7 + $0x8] sm:$0xff]  ;;  %v413_v63 = vld [vmem:[#allocation7] sm:$0xff]  ;;  %v708_v0 = vld [vmem:[#allocation8 + $0x78] sm:$0xff] }
  0x52   :  { %1713 = vmatpush3.msra.mxu0 %v138_v13  ;;  %1787 = vmatpush3.msra.mxu1 %v421_v55  ;;  %v707_v1 = vld [vmem:[#allocation8 + $0x70] sm:$0xff]  ;;  %v706_v2 = vld [vmem:[#allocation8 + $0x68] sm:$0xff]  ;;  %v705_v3 = vld [vmem:[#allocation8 + $0x60] sm:$0xff] }
  0x53   :  { %1714 = vmatprep.subr.mxu0 %v137_v15  ;;  %1788 = vmatprep.subr.mxu1 %v420_v56  ;;  %v704_v4 = vld [vmem:[#allocation8 + $0x58] sm:$0xff]  ;;  %v703_v5 = vld [vmem:[#allocation8 + $0x50] sm:$0xff]  ;;  %v702_v6 = vld [vmem:[#allocation8 + $0x48] sm:$0xff] }
  0x54   :  { %1715 = vmatpush3.msra.mxu0 %v137_v15  ;;  %1789 = vmatpush3.msra.mxu1 %v420_v56  ;;  %v701_v7 = vld [vmem:[#allocation8 + $0x40] sm:$0xff]  ;;  %v700_v8 = vld [vmem:[#allocation8 + $0x38] sm:$0xff]  ;;  %v699_v9 = vld [vmem:[#allocation8 + $0x30] sm:$0xff] }
  0x55   :  { %1716 = vmatprep.subr.mxu0 %v136_v17  ;;  %1790 = vmatprep.subr.mxu1 %v419_v57  ;;  %v698_v10 = vld [vmem:[#allocation8 + $0x28] sm:$0xff]  ;;  %v697_v11 = vld [vmem:[#allocation8 + $0x20] sm:$0xff] }
  0x56   :  { %1717 = vmatpush3.msra.mxu0 %v136_v17  ;;  %1791 = vmatpush3.msra.mxu1 %v419_v57  ;;  %v2559_v12 = vld [vmem:[%s2712_s2] ss:$0 sm:$0xff] }
  0x57   :  { %1718 = vmatprep.subr.mxu0 %v135_v19  ;;  %1792 = vmatprep.subr.mxu1 %v418_v58 }
  0x58   :  { %1719 = vmatpush3.msra.mxu0 %v135_v19  ;;  %1793 = vmatpush3.msra.mxu1 %v418_v58 }
  0x59   :  { %1720 = vmatprep.subr.mxu0 %v134_v21  ;;  %1794 = vmatprep.subr.mxu1 %v417_v59 }
  0x5a   :  { %1721 = vmatpush3.msra.mxu0 %v134_v21  ;;  %1795 = vmatpush3.msra.mxu1 %v417_v59 }
  0x5b   :  { %1722 = vmatprep.subr.mxu0 %v133_v22  ;;  %1796 = vmatprep.subr.mxu1 %v416_v60 }
  0x5c   :  { %1723 = vmatpush3.msra.mxu0 %v133_v22  ;;  %1797 = vmatpush3.msra.mxu1 %v416_v60 }
  0x5d   :  { %1725 = vmatmul.mubr.f32.vlgmr.msra.gmra.mxu0 %v102_v23  ;;  %1798 = vmatprep.subr.mxu1 %v415_v61 }
  0x5e   :  { %1727 = vmatprep.mubr.f32.mxu0 %v103_v24  ;;  %1799 = vmatpush3.msra.mxu1 %v415_v61 }
  0x5f   :  { %1800 = vmatprep.subr.mxu1 %v414_v62  ;;  %1852 = vmatprep.subr.mxu0 %v708_v0 }
  0x60   :  { %1801 = vmatpush3.msra.mxu1 %v414_v62  ;;  %1853 = vmatpush3.msra.mxu0 %v708_v0 }
  0x61   :  { %1728 = vmatmul.mubr.f32.gmra.mxu0 %v104_v25  ;;  %1802 = vmatprep.subr.mxu1 %v413_v63 }
  0x62   :  { %1730 = vmatprep.mubr.f32.mxu0 %v105_v26  ;;  %1803 = vmatpush3.msra.mxu1 %v413_v63 }
  0x63   :  { %1854 = vmatprep.subr.mxu0 %v707_v1 }
  0x64   :  { %1855 = vmatpush3.msra.mxu0 %v707_v1 }
  0x65   :  { %1731 = vmatmul.mubr.f32.gmra.mxu0 %v106_v27  ;;  %1856 = vmatprep.subr.mxu0 %v706_v2 }
  0x66   :  { %1733 = vmatprep.mubr.f32.mxu0 %v107_v28  ;;  %1857 = vmatpush3.msra.mxu0 %v706_v2 }
  0x67   :  { %1858 = vmatprep.subr.mxu0 %v705_v3 }
  0x68   :  { %1859 = vmatpush3.msra.mxu0 %v705_v3 }
  0x69   :  { %1734 = vmatmul.mubr.f32.gmra.mxu0 %v108_v29  ;;  %1860 = vmatprep.subr.mxu0 %v704_v4 }
  0x6a   :  { %1736 = vmatprep.mubr.f32.mxu0 %v109_v30  ;;  %1861 = vmatpush3.msra.mxu0 %v704_v4 }
  0x6b   :  { %1862 = vmatprep.subr.mxu0 %v703_v5 }
  0x6c   :  { %1863 = vmatpush3.msra.mxu0 %v703_v5 }
  0x6d   :  { %1737 = vmatmul.mubr.f32.gmra.mxu0 %v110_v31  ;;  %1864 = vmatprep.subr.mxu0 %v702_v6 }
  0x6e   :  { %1739 = vmatprep.mubr.f32.mxu0 %v111_v32  ;;  %1865 = vmatpush3.msra.mxu0 %v702_v6 }
  0x6f   :  { %1866 = vmatprep.subr.mxu0 %v701_v7 }
  0x70   :  { %1867 = vmatpush3.msra.mxu0 %v701_v7 }
  0x71   :  { %1740 = vmatmul.mubr.f32.gmra.mxu0 %v112_v33  ;;  %1868 = vmatprep.subr.mxu0 %v700_v8 }
  0x72   :  { %1742 = vmatprep.mubr.f32.mxu0 %v113_v34  ;;  %1869 = vmatpush3.msra.mxu0 %v700_v8 }
  0x73   :  { %1870 = vmatprep.subr.mxu0 %v699_v9 }
  0x74   :  { %1871 = vmatpush3.msra.mxu0 %v699_v9 }
  0x75   :  { %1743 = vmatmul.mubr.f32.gmra.mxu0 %v114_v35  ;;  %1872 = vmatprep.subr.mxu0 %v698_v10 }
  0x76   :  { %1745 = vmatprep.mubr.f32.mxu0 %v115_v36  ;;  %1873 = vmatpush3.msra.mxu0 %v698_v10 }
  0x77   :  { %1874 = vmatprep.subr.mxu0 %v697_v11 }
  0x78   :  { %1875 = vmatpush3.msra.mxu0 %v697_v11 }
  0x79   :  { %1746 = vmatmul.mubr.f32.gmra.mxu0 %v116_v37 }
  0x7a   :  { %1748 = vmatprep.mubr.f32.mxu0 %v117_v38 }
  0x7d   :  { %1749 = vmatmul.mubr.f32.gmra.mxu0 %v118_v39 }
  0x7e   :  { %1751 = vmatprep.mubr.f32.mxu0 %v119_v40 }
  0x81   :  { %1752 = vmatmul.mubr.f32.gmra.mxu0 %v120_v41 }
  0x82   :  { %1754 = vmatprep.mubr.f32.mxu0 %v121_v42 }
  0x85   :  { %1755 = vmatmul.mubr.f32.gmra.mxu0 %v122_v43 }
  0x86   :  { %1757 = vmatprep.mubr.f32.mxu0 %v123_v44 }
  0x89   :  { %1758 = vmatmul.mubr.f32.gmra.mxu0 %v124_v45 }
  0x8a   :  { %1760 = vmatprep.mubr.f32.mxu0 %v125_v46 }
  0x8d   :  { %1761 = vmatmul.mubr.f32.gmra.mxu0 %v126_v47 }
  0x8e   :  { %1763 = vmatprep.mubr.f32.mxu0 %v127_v48 }
  0x91   :  { %1764 = vmatmul.mubr.f32.gmra.mxu0 %v128_v49 }
  0x92   :  { %1766 = vmatprep.mubr.f32.mxu0 %v129_v50 }
  0x95   :  { %1767 = vmatmul.mubr.f32.gmra.mxu0 %v130_v51 }
  0x96   :  { %1769 = vmatprep.mubr.f32.mxu0 %v131_v52 }
  0x99   :  { %1770 = vmatmul.mubr.f32.gmra.mxu0 %v132_v53 }
 0x11d   :  { %v1726_v13 = vpop.f32.mrf.mxu0 }
 0x11e   :  { %v228_v14 = vadd.f32 %v1726_v13, %v2559_v12 }
 0x11f   :  { %v222_v15 = vpop.f32.mrf.mxu0 }
 0x120   :  { %v223_v16 = vadd.f32 %v2559_v12, %v222_v15 }
 0x121   :  { %v1729_v17 = vpop.f32.mrf.mxu0 }
 0x122   :  { %2020 = vtanh.f32 %v223_v16  ;;  %v238_v18 = vadd.f32 %v1729_v17, %v2559_v12 }
 0x123   :  { %2022 = vtanh.f32 %v228_v14  ;;  %v232_v19 = vpop.f32.mrf.mxu0 }
 0x124   :  { %v233_v20 = vadd.f32 %v2559_v12, %v232_v19 }
 0x125   :  { %v1732_v21 = vpop.f32.mrf.mxu0 }
 0x126   :  { %2024 = vtanh.f32 %v233_v20  ;;  %v248_v22 = vadd.f32 %v1732_v21, %v2559_v12 }
 0x127   :  { %2026 = vtanh.f32 %v238_v18  ;;  %v242_v23 = vpop.f32.mrf.mxu0 }
 0x128   :  { %v243_v24 = vadd.f32 %v2559_v12, %v242_v23 }
 0x129   :  { %v1735_v25 = vpop.f32.mrf.mxu0 }
 0x12a   :  { %2028 = vtanh.f32 %v243_v24  ;;  %v258_v26 = vadd.f32 %v1735_v25, %v2559_v12 }
 0x12b   :  { %2030 = vtanh.f32 %v248_v22  ;;  %v252_v27 = vpop.f32.mrf.mxu0 }
 0x12c   :  { %v253_v28 = vadd.f32 %v2559_v12, %v252_v27 }
 0x12d   :  { %v1738_v29 = vpop.f32.mrf.mxu0 }
 0x12e   :  { %2032 = vtanh.f32 %v253_v28  ;;  %v268_v31 = vadd.f32 %v1738_v29, %v2559_v12 }
 0x12f   :  { %v2021_v30 = vpop.eup %2020  ;;  %2034 = vtanh.f32 %v258_v26  ;;  %v262_v32 = vpop.f32.mrf.mxu0 }
 0x130   :  { %v2023_v33 = vpop.eup %2022  ;;  %v263_v34 = vadd.f32 %v2559_v12, %v262_v32  ;;  %1804 = vmatprep.mubr.f32.mxu1 %v2021_v30 }
 0x131   :  { %v1741_v35 = vpop.f32.mrf.mxu0  ;;  %1805 = vmatmul.mubr.f32.vlgmr.msra.gmra.mxu1 %v2023_v33 }
 0x132   :  { %2036 = vtanh.f32 %v263_v34  ;;  %v278_v37 = vadd.f32 %v1741_v35, %v2559_v12 }
 0x133   :  { %v2025_v36 = vpop.eup %2024  ;;  %2038 = vtanh.f32 %v268_v31  ;;  %v272_v38 = vpop.f32.mrf.mxu0 }
 0x134   :  { %v2027_v39 = vpop.eup %2026  ;;  %v273_v40 = vadd.f32 %v2559_v12, %v272_v38  ;;  %1807 = vmatprep.mubr.f32.mxu1 %v2025_v36 }
 0x135   :  { %v1744_v41 = vpop.f32.mrf.mxu0  ;;  %1808 = vmatmul.mubr.f32.gmra.mxu1 %v2027_v39 }
 0x136   :  { %2040 = vtanh.f32 %v273_v40  ;;  %v288_v43 = vadd.f32 %v1744_v41, %v2559_v12 }
 0x137   :  { %v2029_v42 = vpop.eup %2028  ;;  %2042 = vtanh.f32 %v278_v37  ;;  %v282_v44 = vpop.f32.mrf.mxu0 }
 0x138   :  { %v2031_v45 = vpop.eup %2030  ;;  %v283_v46 = vadd.f32 %v2559_v12, %v282_v44  ;;  %1810 = vmatprep.mubr.f32.mxu1 %v2029_v42 }
 0x139   :  { %v1747_v47 = vpop.f32.mrf.mxu0  ;;  %1811 = vmatmul.mubr.f32.gmra.mxu1 %v2031_v45 }
 0x13a   :  { %2044 = vtanh.f32 %v283_v46  ;;  %v298_v49 = vadd.f32 %v1747_v47, %v2559_v12  ;;  %v695_v46 = vld [vmem:[#allocation8 + $0x10] sm:$0xff]  ;;  %v694_v47 = vld [vmem:[#allocation8 + $0x8] sm:$0xff] }
 0x13b   :  { %v2033_v48 = vpop.eup %2032  ;;  %2046 = vtanh.f32 %v288_v43  ;;  %v292_v50 = vpop.f32.mrf.mxu0 }
 0x13c   :  { %v2035_v51 = vpop.eup %2034  ;;  %v293_v52 = vadd.f32 %v2559_v12, %v292_v50  ;;  %1813 = vmatprep.mubr.f32.mxu1 %v2033_v48  ;;  %v693_v48 = vld [vmem:[#allocation8] sm:$0xff]  ;;  %v987_v50 = vld [vmem:[#allocation10 + $0x70] sm:$0xff] }
 0x13d   :  { %v1750_v53 = vpop.f32.mrf.mxu0  ;;  %1814 = vmatmul.mubr.f32.gmra.mxu1 %v2035_v51  ;;  %v986_v51 = vld [vmem:[#allocation10 + $0x68] sm:$0xff] }
 0x13e   :  { %2048 = vtanh.f32 %v293_v52  ;;  %v308_v55 = vadd.f32 %v1750_v53, %v2559_v12  ;;  %v985_v52 = vld [vmem:[#allocation10 + $0x60] sm:$0xff]  ;;  %v984_v53 = vld [vmem:[#allocation10 + $0x58] sm:$0xff] }
 0x13f   :  { %v2037_v54 = vpop.eup %2036  ;;  %2050 = vtanh.f32 %v298_v49  ;;  %v302_v56 = vpop.f32.mrf.mxu0  ;;  %v988_v49 = vld [vmem:[#allocation10 + $0x78] sm:$0xff] }
 0x140   :  { %v2039_v57 = vpop.eup %2038  ;;  %v303_v58 = vadd.f32 %v2559_v12, %v302_v56  ;;  %1816 = vmatprep.mubr.f32.mxu1 %v2037_v54  ;;  %1932 = vmatprep.subr.mxu1 %v988_v49  ;;  %v983_v54 = vld [vmem:[#allocation10 + $0x50] sm:$0xff]  ;;  %v981_v56 = vld [vmem:[#allocation10 + $0x40] sm:$0xff] }
 0x141   :  { %v1753_v59 = vpop.f32.mrf.mxu0  ;;  %1817 = vmatmul.mubr.f32.gmra.mxu1 %v2039_v57  ;;  %v980_v57 = vld [vmem:[#allocation10 + $0x38] sm:$0xff] }
 0x142   :  { %2052 = vtanh.f32 %v303_v58  ;;  %v318_v61 = vadd.f32 %v1753_v59, %v2559_v12  ;;  %1933 = vmatpush3.msra.mxu1 %v988_v49  ;;  %v979_v58 = vld [vmem:[#allocation10 + $0x30] sm:$0xff]  ;;  %v978_v59 = vld [vmem:[#allocation10 + $0x28] sm:$0xff] }
 0x143   :  { %v2041_v60 = vpop.eup %2040  ;;  %2054 = vtanh.f32 %v308_v55  ;;  %v312_v62 = vpop.f32.mrf.mxu0  ;;  %1934 = vmatprep.subr.mxu1 %v987_v50  ;;  %v982_v55 = vld [vmem:[#allocation10 + $0x48] sm:$0xff] }
 0x144   :  { %v2043_v63 = vpop.eup %2042  ;;  %v313_v0 = vadd.f32 %v2559_v12, %v312_v62  ;;  %1819 = vmatprep.mubr.f32.mxu1 %v2041_v60  ;;  %1935 = vmatpush3.msra.mxu1 %v987_v50  ;;  %v977_v60 = vld [vmem:[#allocation10 + $0x20] sm:$0xff] }
 0x145   :  { %v1756_v1 = vpop.f32.mrf.mxu0  ;;  %1820 = vmatmul.mubr.f32.gmra.mxu1 %v2043_v63  ;;  %1936 = vmatprep.subr.mxu1 %v986_v51 }
 0x146   :  { %2056 = vtanh.f32 %v313_v0  ;;  %v328_v3 = vadd.f32 %v1756_v1, %v2559_v12  ;;  %1937 = vmatpush3.msra.mxu1 %v986_v51 }
 0x147   :  { %v2045_v2 = vpop.eup %2044  ;;  %2058 = vtanh.f32 %v318_v61  ;;  %v322_v4 = vpop.f32.mrf.mxu0  ;;  %1938 = vmatprep.subr.mxu1 %v985_v52  ;;  %v2596_v61 = vld [vmem:[%s2714_s4] ss:$0 sm:$0xff] }
 0x148   :  { %v2047_v5 = vpop.eup %2046  ;;  %v323_v6 = vadd.f32 %v2559_v12, %v322_v4  ;;  %1822 = vmatprep.mubr.f32.mxu1 %v2045_v2  ;;  %1939 = vmatpush3.msra.mxu1 %v985_v52 }
 0x149   :  { %v1759_v7 = vpop.f32.mrf.mxu0  ;;  %1823 = vmatmul.mubr.f32.gmra.mxu1 %v2047_v5  ;;  %1940 = vmatprep.subr.mxu1 %v984_v53 }
 0x14a   :  { %2060 = vtanh.f32 %v323_v6  ;;  %v338_v9 = vadd.f32 %v1759_v7, %v2559_v12  ;;  %1941 = vmatpush3.msra.mxu1 %v984_v53 }
 0x14b   :  { %v2049_v8 = vpop.eup %2048  ;;  %2062 = vtanh.f32 %v328_v3  ;;  %v332_v10 = vpop.f32.mrf.mxu0  ;;  %1942 = vmatprep.subr.mxu1 %v983_v54 }
 0x14c   :  { %v2051_v11 = vpop.eup %2050  ;;  %v333_v13 = vadd.f32 %v2559_v12, %v332_v10  ;;  %1825 = vmatprep.mubr.f32.mxu1 %v2049_v8  ;;  %1943 = vmatpush3.msra.mxu1 %v983_v54 }
 0x14d   :  { %v1762_v14 = vpop.f32.mrf.mxu0  ;;  %1826 = vmatmul.mubr.f32.gmra.mxu1 %v2051_v11  ;;  %1944 = vmatprep.subr.mxu1 %v982_v55 }
 0x14e   :  { %2064 = vtanh.f32 %v333_v13  ;;  %v348_v16 = vadd.f32 %v1762_v14, %v2559_v12  ;;  %1945 = vmatpush3.msra.mxu1 %v982_v55 }
 0x14f   :  { %v2053_v15 = vpop.eup %2052  ;;  %2066 = vtanh.f32 %v338_v9  ;;  %v342_v17 = vpop.f32.mrf.mxu0  ;;  %1946 = vmatprep.subr.mxu1 %v981_v56 }
 0x150   :  { %v2055_v18 = vpop.eup %2054  ;;  %v343_v19 = vadd.f32 %v2559_v12, %v342_v17  ;;  %1828 = vmatprep.mubr.f32.mxu1 %v2053_v15  ;;  %1947 = vmatpush3.msra.mxu1 %v981_v56 }
 0x151   :  { %v1765_v20 = vpop.f32.mrf.mxu0  ;;  %1829 = vmatmul.mubr.f32.gmra.mxu1 %v2055_v18  ;;  %1948 = vmatprep.subr.mxu1 %v980_v57 }
 0x152   :  { %2068 = vtanh.f32 %v343_v19  ;;  %v358_v22 = vadd.f32 %v1765_v20, %v2559_v12  ;;  %1949 = vmatpush3.msra.mxu1 %v980_v57 }
 0x153   :  { %v2057_v21 = vpop.eup %2056  ;;  %2070 = vtanh.f32 %v348_v16  ;;  %v352_v23 = vpop.f32.mrf.mxu0  ;;  %1950 = vmatprep.subr.mxu1 %v979_v58 }
 0x154   :  { %v2059_v24 = vpop.eup %2058  ;;  %v353_v25 = vadd.f32 %v2559_v12, %v352_v23  ;;  %1831 = vmatprep.mubr.f32.mxu1 %v2057_v21  ;;  %1951 = vmatpush3.msra.mxu1 %v979_v58 }
 0x155   :  { %v1768_v26 = vpop.f32.mrf.mxu0  ;;  %1832 = vmatmul.mubr.f32.gmra.mxu1 %v2059_v24  ;;  %1952 = vmatprep.subr.mxu1 %v978_v59 }
 0x156   :  { %2072 = vtanh.f32 %v353_v25  ;;  %v368_v28 = vadd.f32 %v1768_v26, %v2559_v12  ;;  %1953 = vmatpush3.msra.mxu1 %v978_v59 }
 0x157   :  { %v2061_v27 = vpop.eup %2060  ;;  %2074 = vtanh.f32 %v358_v22  ;;  %v362_v29 = vpop.f32.mrf.mxu0  ;;  %1954 = vmatprep.subr.mxu1 %v977_v60 }
 0x158   :  { %v2063_v30 = vpop.eup %2062  ;;  %v363_v31 = vadd.f32 %v2559_v12, %v362_v29  ;;  %1834 = vmatprep.mubr.f32.mxu1 %v2061_v27  ;;  %1955 = vmatpush3.msra.mxu1 %v977_v60 }
 0x159   :  { %v1771_v32 = vpop.f32.mrf.mxu0  ;;  %1835 = vmatmul.mubr.f32.gmra.mxu1 %v2063_v30 }
 0x15a   :  { %2076 = vtanh.f32 %v363_v31  ;;  %v378_v34 = vadd.f32 %v1771_v32, %v2559_v12 }
 0x15b   :  { %v2065_v33 = vpop.eup %2064  ;;  %2078 = vtanh.f32 %v368_v28  ;;  %v372_v35 = vpop.f32.mrf.mxu0 }
 0x15c   :  { %v2067_v36 = vpop.eup %2066  ;;  %v373_v37 = vadd.f32 %v2559_v12, %v372_v35  ;;  %1837 = vmatprep.mubr.f32.mxu1 %v2065_v33  ;;  %v696_v12 = vld [vmem:[#allocation8 + $0x18] sm:$0xff] }
 0x15d   :  { %1838 = vmatmul.mubr.f32.gmra.mxu1 %v2067_v36  ;;  %1876 = vmatprep.subr.mxu0 %v696_v12 }
 0x15e   :  { %2080 = vtanh.f32 %v373_v37  ;;  %1877 = vmatpush3.msra.mxu0 %v696_v12 }
 0x15f   :  { %v2069_v38 = vpop.eup %2068  ;;  %2082 = vtanh.f32 %v378_v34  ;;  %1878 = vmatprep.subr.mxu0 %v695_v46 }
 0x160   :  { %v2071_v39 = vpop.eup %2070  ;;  %1840 = vmatprep.mubr.f32.mxu1 %v2069_v38  ;;  %1879 = vmatpush3.msra.mxu0 %v695_v46 }
 0x161   :  { %1841 = vmatmul.mubr.f32.gmra.mxu1 %v2071_v39  ;;  %1880 = vmatprep.subr.mxu0 %v694_v47 }
 0x162   :  { %1881 = vmatpush3.msra.mxu0 %v694_v47 }
 0x163   :  { %v2073_v40 = vpop.eup %2072  ;;  %1882 = vmatprep.subr.mxu0 %v693_v48 }
 0x164   :  { %v2075_v41 = vpop.eup %2074  ;;  %1843 = vmatprep.mubr.f32.mxu1 %v2073_v40  ;;  %1883 = vmatpush3.msra.mxu0 %v693_v48 }
 0x165   :  { %1844 = vmatmul.mubr.f32.gmra.mxu1 %v2075_v41 }
 0x167   :  { %v2077_v42 = vpop.eup %2076 }
 0x168   :  { %v2079_v43 = vpop.eup %2078  ;;  %1846 = vmatprep.mubr.f32.mxu1 %v2077_v42 }
 0x169   :  { %1847 = vmatmul.mubr.f32.gmra.mxu1 %v2079_v43 }
 0x16b   :  { %v2081_v44 = vpop.eup %2080 }
 0x16c   :  { %v2083_v45 = vpop.eup %2082  ;;  %1849 = vmatprep.mubr.f32.mxu1 %v2081_v44 }
 0x16d   :  { %1850 = vmatmul.mubr.f32.gmra.mxu1 %v2083_v45 }
 0x1f1   :  { %v1806_v62 = vpop.f32.mrf.mxu1 }
 0x1f2   :  { %v508_v63 = vadd.f32 %v1806_v62, %v2596_v61 }
 0x1f3   :  { %v502_v0 = vpop.f32.mrf.mxu1 }
 0x1f4   :  { %v503_v1 = vadd.f32 %v2596_v61, %v502_v0 }
 0x1f5   :  { %v1809_v2 = vpop.f32.mrf.mxu1 }
 0x1f6   :  { %2084 = vtanh.f32 %v503_v1  ;;  %v518_v3 = vadd.f32 %v1809_v2, %v2596_v61 }
 0x1f7   :  { %2086 = vtanh.f32 %v508_v63  ;;  %v512_v4 = vpop.f32.mrf.mxu1 }
 0x1f8   :  { %v513_v5 = vadd.f32 %v2596_v61, %v512_v4 }
 0x1f9   :  { %v1812_v6 = vpop.f32.mrf.mxu1 }
 0x1fa   :  { %2088 = vtanh.f32 %v513_v5  ;;  %v528_v7 = vadd.f32 %v1812_v6, %v2596_v61 }
 0x1fb   :  { %2090 = vtanh.f32 %v518_v3  ;;  %v522_v8 = vpop.f32.mrf.mxu1 }
 0x1fc   :  { %v523_v9 = vadd.f32 %v2596_v61, %v522_v8 }
 0x1fd   :  { %v1815_v10 = vpop.f32.mrf.mxu1 }
 0x1fe   :  { %2092 = vtanh.f32 %v523_v9  ;;  %v538_v11 = vadd.f32 %v1815_v10, %v2596_v61 }
 0x1ff   :  { %2094 = vtanh.f32 %v528_v7  ;;  %v532_v13 = vpop.f32.mrf.mxu1 }
 0x200   :  { %v533_v14 = vadd.f32 %v2596_v61, %v532_v13 }
 0x201   :  { %v1818_v15 = vpop.f32.mrf.mxu1 }
 0x202   :  { %2096 = vtanh.f32 %v533_v14  ;;  %v548_v17 = vadd.f32 %v1818_v15, %v2596_v61 }
 0x203   :  { %v2085_v16 = vpop.eup %2084  ;;  %2098 = vtanh.f32 %v538_v11  ;;  %v542_v18 = vpop.f32.mrf.mxu1 }
 0x204   :  { %v2087_v19 = vpop.eup %2086  ;;  %v543_v20 = vadd.f32 %v2596_v61, %v542_v18  ;;  %1884 = vmatprep.mubr.f32.mxu0 %v2085_v16 }
 0x205   :  { %v1821_v21 = vpop.f32.mrf.mxu1  ;;  %1885 = vmatmul.mubr.f32.vlgmr.msra.gmra.mxu0 %v2087_v19 }
 0x206   :  { %2100 = vtanh.f32 %v543_v20  ;;  %v558_v23 = vadd.f32 %v1821_v21, %v2596_v61 }
 0x207   :  { %v2089_v22 = vpop.eup %2088  ;;  %2102 = vtanh.f32 %v548_v17  ;;  %v552_v24 = vpop.f32.mrf.mxu1 }
 0x208   :  { %v2091_v25 = vpop.eup %2090  ;;  %v553_v26 = vadd.f32 %v2596_v61, %v552_v24  ;;  %1887 = vmatprep.mubr.f32.mxu0 %v2089_v22 }
 0x209   :  { %v1824_v27 = vpop.f32.mrf.mxu1  ;;  %1888 = vmatmul.mubr.f32.gmra.mxu0 %v2091_v25 }
 0x20a   :  { %2104 = vtanh.f32 %v553_v26  ;;  %v568_v29 = vadd.f32 %v1824_v27, %v2596_v61 }
 0x20b   :  { %v2093_v28 = vpop.eup %2092  ;;  %2106 = vtanh.f32 %v558_v23  ;;  %v562_v30 = vpop.f32.mrf.mxu1 }
 0x20c   :  { %v2095_v31 = vpop.eup %2094  ;;  %v563_v32 = vadd.f32 %v2596_v61, %v562_v30  ;;  %1890 = vmatprep.mubr.f32.mxu0 %v2093_v28 }
 0x20d   :  { %v1827_v33 = vpop.f32.mrf.mxu1  ;;  %1891 = vmatmul.mubr.f32.gmra.mxu0 %v2095_v31 }
 0x20e   :  { %2108 = vtanh.f32 %v563_v32  ;;  %v578_v35 = vadd.f32 %v1827_v33, %v2596_v61  ;;  %v975_v32 = vld [vmem:[#allocation10 + $0x10] sm:$0xff]  ;;  %v974_v33 = vld [vmem:[#allocation10 + $0x8] sm:$0xff] }
 0x20f   :  { %v2097_v34 = vpop.eup %2096  ;;  %2110 = vtanh.f32 %v568_v29  ;;  %v572_v36 = vpop.f32.mrf.mxu1 }
 0x210   :  { %v2099_v37 = vpop.eup %2098  ;;  %v573_v38 = vadd.f32 %v2596_v61, %v572_v36  ;;  %1893 = vmatprep.mubr.f32.mxu0 %v2097_v34  ;;  %v973_v34 = vld [vmem:[#allocation10] sm:$0xff] }
 0x211   :  { %v1830_v39 = vpop.f32.mrf.mxu1  ;;  %1894 = vmatmul.mubr.f32.gmra.mxu0 %v2099_v37 }
 0x212   :  { %2112 = vtanh.f32 %v573_v38  ;;  %v588_v41 = vadd.f32 %v1830_v39, %v2596_v61 }
 0x213   :  { %v2101_v40 = vpop.eup %2100  ;;  %2114 = vtanh.f32 %v578_v35  ;;  %v582_v42 = vpop.f32.mrf.mxu1  ;;  %v2633_v35 = vld [vmem:[%s2716_s6] ss:$0 sm:$0xff] }
 0x214   :  { %v2103_v43 = vpop.eup %2102  ;;  %v583_v44 = vadd.f32 %v2596_v61, %v582_v42  ;;  %1896 = vmatprep.mubr.f32.mxu0 %v2101_v40 }
 0x215   :  { %v1833_v45 = vpop.f32.mrf.mxu1  ;;  %1897 = vmatmul.mubr.f32.gmra.mxu0 %v2103_v43 }
 0x216   :  { %2116 = vtanh.f32 %v583_v44  ;;  %v598_v46 = vadd.f32 %v1833_v45, %v2596_v61 }
 0x217   :  { %v2105_v12 = vpop.eup %2104  ;;  %2118 = vtanh.f32 %v588_v41  ;;  %v592_v47 = vpop.f32.mrf.mxu1 }
 0x218   :  { %v2107_v48 = vpop.eup %2106  ;;  %v593_v49 = vadd.f32 %v2596_v61, %v592_v47  ;;  %1899 = vmatprep.mubr.f32.mxu0 %v2105_v12 }
 0x219   :  { %v1836_v50 = vpop.f32.mrf.mxu1  ;;  %1900 = vmatmul.mubr.f32.gmra.mxu0 %v2107_v48 }
 0x21a   :  { %2120 = vtanh.f32 %v593_v49  ;;  %v608_v52 = vadd.f32 %v1836_v50, %v2596_v61 }
 0x21b   :  { %v2109_v51 = vpop.eup %2108  ;;  %2122 = vtanh.f32 %v598_v46  ;;  %v602_v53 = vpop.f32.mrf.mxu1 }
 0x21c   :  { %v2111_v54 = vpop.eup %2110  ;;  %v603_v55 = vadd.f32 %v2596_v61, %v602_v53  ;;  %1902 = vmatprep.mubr.f32.mxu0 %v2109_v51 }
 0x21d   :  { %v1839_v56 = vpop.f32.mrf.mxu1  ;;  %1903 = vmatmul.mubr.f32.gmra.mxu0 %v2111_v54 }
 0x21e   :  { %2124 = vtanh.f32 %v603_v55  ;;  %v618_v58 = vadd.f32 %v1839_v56, %v2596_v61 }
 0x21f   :  { %v2113_v57 = vpop.eup %2112  ;;  %2126 = vtanh.f32 %v608_v52  ;;  %v612_v59 = vpop.f32.mrf.mxu1 }
 0x220   :  { %v2115_v60 = vpop.eup %2114  ;;  %v613_v62 = vadd.f32 %v2596_v61, %v612_v59  ;;  %1905 = vmatprep.mubr.f32.mxu0 %v2113_v57 }
 0x221   :  { %v1842_v63 = vpop.f32.mrf.mxu1  ;;  %1906 = vmatmul.mubr.f32.gmra.mxu0 %v2115_v60 }
 0x222   :  { %2128 = vtanh.f32 %v613_v62  ;;  %v628_v1 = vadd.f32 %v1842_v63, %v2596_v61 }
 0x223   :  { %v2117_v0 = vpop.eup %2116  ;;  %2130 = vtanh.f32 %v618_v58  ;;  %v622_v2 = vpop.f32.mrf.mxu1 }
 0x224   :  { %v2119_v3 = vpop.eup %2118  ;;  %v623_v4 = vadd.f32 %v2596_v61, %v622_v2  ;;  %1908 = vmatprep.mubr.f32.mxu0 %v2117_v0 }
 0x225   :  { %v1845_v5 = vpop.f32.mrf.mxu1  ;;  %1909 = vmatmul.mubr.f32.gmra.mxu0 %v2119_v3 }
 0x226   :  { %2132 = vtanh.f32 %v623_v4  ;;  %v638_v7 = vadd.f32 %v1845_v5, %v2596_v61 }
 0x227   :  { %v2121_v6 = vpop.eup %2120  ;;  %2134 = vtanh.f32 %v628_v1  ;;  %v632_v8 = vpop.f32.mrf.mxu1 }
 0x228   :  { %v2123_v9 = vpop.eup %2122  ;;  %v633_v10 = vadd.f32 %v2596_v61, %v632_v8  ;;  %1911 = vmatprep.mubr.f32.mxu0 %v2121_v6 }
 0x229   :  { %v1848_v11 = vpop.f32.mrf.mxu1  ;;  %1912 = vmatmul.mubr.f32.gmra.mxu0 %v2123_v9 }
 0x22a   :  { %2136 = vtanh.f32 %v633_v10  ;;  %v648_v14 = vadd.f32 %v1848_v11, %v2596_v61 }
 0x22b   :  { %v2125_v13 = vpop.eup %2124  ;;  %2138 = vtanh.f32 %v638_v7  ;;  %v642_v15 = vpop.f32.mrf.mxu1 }
 0x22c   :  { %v2127_v16 = vpop.eup %2126  ;;  %v643_v17 = vadd.f32 %v2596_v61, %v642_v15  ;;  %1914 = vmatprep.mubr.f32.mxu0 %v2125_v13 }
 0x22d   :  { %v1851_v18 = vpop.f32.mrf.mxu1  ;;  %1915 = vmatmul.mubr.f32.gmra.mxu0 %v2127_v16 }
 0x22e   :  { %2140 = vtanh.f32 %v643_v17  ;;  %v658_v20 = vadd.f32 %v1851_v18, %v2596_v61 }
 0x22f   :  { %v2129_v19 = vpop.eup %2128  ;;  %2142 = vtanh.f32 %v648_v14  ;;  %v652_v21 = vpop.f32.mrf.mxu1 }
 0x230   :  { %v2131_v22 = vpop.eup %2130  ;;  %v653_v23 = vadd.f32 %v2596_v61, %v652_v21  ;;  %1917 = vmatprep.mubr.f32.mxu0 %v2129_v19  ;;  %v976_v61 = vld [vmem:[#allocation10 + $0x18] sm:$0xff] }
 0x231   :  { %1918 = vmatmul.mubr.f32.gmra.mxu0 %v2131_v22  ;;  %1956 = vmatprep.subr.mxu1 %v976_v61 }
 0x232   :  { %2144 = vtanh.f32 %v653_v23  ;;  %1957 = vmatpush3.msra.mxu1 %v976_v61 }
 0x233   :  { %v2133_v24 = vpop.eup %2132  ;;  %2146 = vtanh.f32 %v658_v20  ;;  %1958 = vmatprep.subr.mxu1 %v975_v32 }
 0x234   :  { %v2135_v25 = vpop.eup %2134  ;;  %1920 = vmatprep.mubr.f32.mxu0 %v2133_v24  ;;  %1959 = vmatpush3.msra.mxu1 %v975_v32 }
 0x235   :  { %1921 = vmatmul.mubr.f32.gmra.mxu0 %v2135_v25  ;;  %1960 = vmatprep.subr.mxu1 %v974_v33 }
 0x236   :  { %1961 = vmatpush3.msra.mxu1 %v974_v33 }
 0x237   :  { %v2137_v26 = vpop.eup %2136  ;;  %1962 = vmatprep.subr.mxu1 %v973_v34 }
 0x238   :  { %v2139_v27 = vpop.eup %2138  ;;  %1923 = vmatprep.mubr.f32.mxu0 %v2137_v26  ;;  %1963 = vmatpush3.msra.mxu1 %v973_v34 }
 0x239   :  { %1924 = vmatmul.mubr.f32.gmra.mxu0 %v2139_v27 }
 0x23b   :  { %v2141_v28 = vpop.eup %2140 }
 0x23c   :  { %v2143_v29 = vpop.eup %2142  ;;  %1926 = vmatprep.mubr.f32.mxu0 %v2141_v28 }
 0x23d   :  { %1927 = vmatmul.mubr.f32.gmra.mxu0 %v2143_v29 }
 0x23f   :  { %v2145_v30 = vpop.eup %2144 }
 0x240   :  { %v2147_v31 = vpop.eup %2146  ;;  %1929 = vmatprep.mubr.f32.mxu0 %v2145_v30 }
 0x241   :  { %1930 = vmatmul.mubr.f32.gmra.mxu0 %v2147_v31 }
 0x2c5   :  { %v1886_v36 = vpop.f32.mrf.mxu0 }
 0x2c6   :  { %v788_v37 = vadd.f32 %v1886_v36, %v2633_v35 }
 0x2c7   :  { %v782_v38 = vpop.f32.mrf.mxu0 }
 0x2c8   :  { %v783_v39 = vadd.f32 %v2633_v35, %v782_v38 }
 0x2c9   :  { %v1889_v40 = vpop.f32.mrf.mxu0 }
 0x2ca   :  { %2148 = vtanh.f32 %v783_v39  ;;  %v798_v41 = vadd.f32 %v1889_v40, %v2633_v35 }
 0x2cb   :  { %2150 = vtanh.f32 %v788_v37  ;;  %v792_v42 = vpop.f32.mrf.mxu0 }
 0x2cc   :  { %v793_v43 = vadd.f32 %v2633_v35, %v792_v42 }
 0x2cd   :  { %v1892_v44 = vpop.f32.mrf.mxu0 }
 0x2ce   :  { %2152 = vtanh.f32 %v793_v43  ;;  %v808_v45 = vadd.f32 %v1892_v44, %v2633_v35 }
 0x2cf   :  { %2154 = vtanh.f32 %v798_v41  ;;  %v802_v12 = vpop.f32.mrf.mxu0 }
 0x2d0   :  { %v803_v46 = vadd.f32 %v2633_v35, %v802_v12 }
 0x2d1   :  { %v1895_v47 = vpop.f32.mrf.mxu0 }
 0x2d2   :  { %2156 = vtanh.f32 %v803_v46  ;;  %v818_v48 = vadd.f32 %v1895_v47, %v2633_v35 }
 0x2d3   :  { %2158 = vtanh.f32 %v808_v45  ;;  %v812_v49 = vpop.f32.mrf.mxu0 }
 0x2d4   :  { %v813_v50 = vadd.f32 %v2633_v35, %v812_v49 }
 0x2d5   :  { %v1898_v51 = vpop.f32.mrf.mxu0 }
 0x2d6   :  { %2160 = vtanh.f32 %v813_v50  ;;  %v828_v53 = vadd.f32 %v1898_v51, %v2633_v35 }
 0x2d7   :  { %v2149_v52 = vpop.eup %2148  ;;  %2162 = vtanh.f32 %v818_v48  ;;  %v822_v54 = vpop.f32.mrf.mxu0 }
 0x2d8   :  { %v2151_v55 = vpop.eup %2150  ;;  %v823_v56 = vadd.f32 %v2633_v35, %v822_v54  ;;  %1964 = vmatprep.mubr.f32.mxu1 %v2149_v52 }
 0x2d9   :  { %v1901_v57 = vpop.f32.mrf.mxu0  ;;  %1965 = vmatmul.mubr.f32.vlgmr.msra.gmra.mxu1 %v2151_v55 }
 0x2da   :  { %2164 = vtanh.f32 %v823_v56  ;;  %v838_v59 = vadd.f32 %v1901_v57, %v2633_v35 }
 0x2db   :  { %v2153_v58 = vpop.eup %2152  ;;  %2166 = vtanh.f32 %v828_v53  ;;  %v832_v60 = vpop.f32.mrf.mxu0 }
 0x2dc   :  { %v2155_v62 = vpop.eup %2154  ;;  %v833_v63 = vadd.f32 %v2633_v35, %v832_v60  ;;  %1967 = vmatprep.mubr.f32.mxu1 %v2153_v58 }
 0x2dd   :  { %v1904_v0 = vpop.f32.mrf.mxu0  ;;  %1968 = vmatmul.mubr.f32.gmra.mxu1 %v2155_v62 }
 0x2de   :  { %2168 = vtanh.f32 %v833_v63  ;;  %v848_v2 = vadd.f32 %v1904_v0, %v2633_v35 }
 0x2df   :  { %v2157_v1 = vpop.eup %2156  ;;  %2170 = vtanh.f32 %v838_v59  ;;  %v842_v3 = vpop.f32.mrf.mxu0 }
 0x2e0   :  { %v2159_v4 = vpop.eup %2158  ;;  %v843_v5 = vadd.f32 %v2633_v35, %v842_v3  ;;  %1970 = vmatprep.mubr.f32.mxu1 %v2157_v1 }
 0x2e1   :  { %v1907_v6 = vpop.f32.mrf.mxu0  ;;  %1971 = vmatmul.mubr.f32.gmra.mxu1 %v2159_v4 }
 0x2e2   :  { %2172 = vtanh.f32 %v843_v5  ;;  %v858_v8 = vadd.f32 %v1907_v6, %v2633_v35 }
 0x2e3   :  { %v2161_v7 = vpop.eup %2160  ;;  %2174 = vtanh.f32 %v848_v2  ;;  %v852_v9 = vpop.f32.mrf.mxu0 }
 0x2e4   :  { %v2163_v10 = vpop.eup %2162  ;;  %v853_v11 = vadd.f32 %v2633_v35, %v852_v9  ;;  %1973 = vmatprep.mubr.f32.mxu1 %v2161_v7 }
 0x2e5   :  { %v1910_v13 = vpop.f32.mrf.mxu0  ;;  %1974 = vmatmul.mubr.f32.gmra.mxu1 %v2163_v10 }
 0x2e6   :  { %2176 = vtanh.f32 %v853_v11  ;;  %v868_v15 = vadd.f32 %v1910_v13, %v2633_v35 }
 0x2e7   :  { %v2165_v14 = vpop.eup %2164  ;;  %2178 = vtanh.f32 %v858_v8  ;;  %v862_v16 = vpop.f32.mrf.mxu0 }
 0x2e8   :  { %v2167_v17 = vpop.eup %2166  ;;  %v863_v18 = vadd.f32 %v2633_v35, %v862_v16  ;;  %1976 = vmatprep.mubr.f32.mxu1 %v2165_v14 }
 0x2e9   :  { %v1913_v19 = vpop.f32.mrf.mxu0  ;;  %1977 = vmatmul.mubr.f32.gmra.mxu1 %v2167_v17 }
 0x2ea   :  { %2180 = vtanh.f32 %v863_v18  ;;  %v878_v21 = vadd.f32 %v1913_v19, %v2633_v35 }
 0x2eb   :  { %v2169_v20 = vpop.eup %2168  ;;  %2182 = vtanh.f32 %v868_v15  ;;  %v872_v22 = vpop.f32.mrf.mxu0 }
 0x2ec   :  { %v2171_v23 = vpop.eup %2170  ;;  %v873_v24 = vadd.f32 %v2633_v35, %v872_v22  ;;  %1979 = vmatprep.mubr.f32.mxu1 %v2169_v20 }
 0x2ed   :  { %v1916_v25 = vpop.f32.mrf.mxu0  ;;  %1980 = vmatmul.mubr.f32.gmra.mxu1 %v2171_v23 }
 0x2ee   :  { %2184 = vtanh.f32 %v873_v24  ;;  %v888_v27 = vadd.f32 %v1916_v25, %v2633_v35 }
 0x2ef   :  { %v2173_v26 = vpop.eup %2172  ;;  %2186 = vtanh.f32 %v878_v21  ;;  %v882_v28 = vpop.f32.mrf.mxu0 }
 0x2f0   :  { %v2175_v29 = vpop.eup %2174  ;;  %v883_v30 = vadd.f32 %v2633_v35, %v882_v28  ;;  %1982 = vmatprep.mubr.f32.mxu1 %v2173_v26 }
 0x2f1   :  { %v1919_v31 = vpop.f32.mrf.mxu0  ;;  %1983 = vmatmul.mubr.f32.gmra.mxu1 %v2175_v29 }
 0x2f2   :  { %2188 = vtanh.f32 %v883_v30  ;;  %v898_v32 = vadd.f32 %v1919_v31, %v2633_v35 }
 0x2f3   :  { %v2177_v61 = vpop.eup %2176  ;;  %2190 = vtanh.f32 %v888_v27  ;;  %v892_v33 = vpop.f32.mrf.mxu0 }
 0x2f4   :  { %v2179_v34 = vpop.eup %2178  ;;  %v893_v36 = vadd.f32 %v2633_v35, %v892_v33  ;;  %1985 = vmatprep.mubr.f32.mxu1 %v2177_v61 }
 0x2f5   :  { %v1922_v37 = vpop.f32.mrf.mxu0  ;;  %1986 = vmatmul.mubr.f32.gmra.mxu1 %v2179_v34 }
 0x2f6   :  { %2192 = vtanh.f32 %v893_v36  ;;  %v908_v39 = vadd.f32 %v1922_v37, %v2633_v35 }
 0x2f7   :  { %v2181_v38 = vpop.eup %2180  ;;  %2194 = vtanh.f32 %v898_v32  ;;  %v902_v40 = vpop.f32.mrf.mxu0 }
 0x2f8   :  { %v2183_v41 = vpop.eup %2182  ;;  %v903_v42 = vadd.f32 %v2633_v35, %v902_v40  ;;  %1988 = vmatprep.mubr.f32.mxu1 %v2181_v38 }
 0x2f9   :  { %v1925_v43 = vpop.f32.mrf.mxu0  ;;  %1989 = vmatmul.mubr.f32.gmra.mxu1 %v2183_v41 }
 0x2fa   :  { %2196 = vtanh.f32 %v903_v42  ;;  %v918_v45 = vadd.f32 %v1925_v43, %v2633_v35 }
 0x2fb   :  { %v2185_v44 = vpop.eup %2184  ;;  %2198 = vtanh.f32 %v908_v39  ;;  %v912_v12 = vpop.f32.mrf.mxu0 }
 0x2fc   :  { %v2187_v46 = vpop.eup %2186  ;;  %v913_v47 = vadd.f32 %v2633_v35, %v912_v12  ;;  %1991 = vmatprep.mubr.f32.mxu1 %v2185_v44 }
 0x2fd   :  { %v1928_v48 = vpop.f32.mrf.mxu0  ;;  %1992 = vmatmul.mubr.f32.gmra.mxu1 %v2187_v46 }
 0x2fe   :  { %2200 = vtanh.f32 %v913_v47  ;;  %v928_v50 = vadd.f32 %v1928_v48, %v2633_v35 }
 0x2ff   :  { %v2189_v49 = vpop.eup %2188  ;;  %2202 = vtanh.f32 %v918_v45  ;;  %v922_v51 = vpop.f32.mrf.mxu0 }
 0x300   :  { %v2191_v52 = vpop.eup %2190  ;;  %v923_v53 = vadd.f32 %v2633_v35, %v922_v51  ;;  %1994 = vmatprep.mubr.f32.mxu1 %v2189_v49 }
 0x301   :  { %v1931_v54 = vpop.f32.mrf.mxu0  ;;  %1995 = vmatmul.mubr.f32.gmra.mxu1 %v2191_v52 }
 0x302   :  { %2204 = vtanh.f32 %v923_v53  ;;  %v938_v56 = vadd.f32 %v1931_v54, %v2633_v35 }
 0x303   :  { %v2193_v55 = vpop.eup %2192  ;;  %2206 = vtanh.f32 %v928_v50  ;;  %v932_v57 = vpop.f32.mrf.mxu0 }
 0x304   :  { %v2195_v58 = vpop.eup %2194  ;;  %v933_v59 = vadd.f32 %v2633_v35, %v932_v57  ;;  %1997 = vmatprep.mubr.f32.mxu1 %v2193_v55  ;;  %v2670_v35 = vld [vmem:[%s2718_s8] ss:$0 sm:$0xff]  ;;  %s2475_s8 = smov [#allocation11]  }
 0x305   :  { %1998 = vmatmul.mubr.f32.gmra.mxu1 %v2195_v58  ;;  %s1450_s17 = sshll.u32 %s2475_s8, 4  ;;  %s1451_s17 = int_to_ptr.vmem [resolvable:$true] %s1450_s17 }
 0x306   :  { %2208 = vtanh.f32 %v933_v59  ;;  %s2440_s18 = scalar_lea.vmem %s1451_s17, 4096  ;;  %p2445_p12 = scmp.lt.s32.totalorder %s1451_s17, %s1451_s17 }
 0x307   :  { %v2197_v60 = vpop.eup %2196  ;;  %2210 = vtanh.f32 %v938_v56  ;;  %p2441_p11 = scmp.ne.s32.totalorder %s1451_s17, %s2440_s18  ;;  %p2446_p13 = scmp.lt.s32.totalorder %s2440_s18, %s2440_s18 }
 0x308   :  { %v2199_v62 = vpop.eup %2198  ;;  %2000 = vmatprep.mubr.f32.mxu1 %v2197_v60 }
 0x309   :  { %2001 = vmatmul.mubr.f32.gmra.mxu1 %v2199_v62  ;;  %p2447_p0 = por %p2446_p13, %p2445_p12 }
 0x30b   :  { %v2201_v63 = vpop.eup %2200  ;;  %p2448_p1 = pnand %p2447_p0, %p2441_p11 }
 0x30c   :  { %v2203_v0 = vpop.eup %2202  ;;  %2003 = vmatprep.mubr.f32.mxu1 %v2201_v63 }
 0x30d   :  { %2004 = vmatmul.mubr.f32.gmra.mxu1 %v2203_v0 }
 0x30f   :  { %v2205_v1 = vpop.eup %2204 }
 0x310   :  { %v2207_v2 = vpop.eup %2206  ;;  %2006 = vmatprep.mubr.f32.mxu1 %v2205_v1 }
 0x311   :  { %2007 = vmatmul.mubr.f32.gmra.mxu1 %v2207_v2 }
 0x313   :  { %v2209_v3 = vpop.eup %2208 }
 0x314   :  { %v2211_v4 = vpop.eup %2210  ;;  %2009 = vmatprep.mubr.f32.mxu1 %v2209_v3 }
 0x315   :  { %2010 = vmatmul.mubr.f32.gmra.mxu1 %v2211_v4 }
 0x399   :  { %v1966_v5 = vpop.f32.mrf.mxu1 }
 0x39a   :  { %v1068_v6 = vadd.f32 %v1966_v5, %v2670_v35 }
 0x39b   :  { %v1062_v7 = vpop.f32.mrf.mxu1 }
 0x39c   :  { %v1469_v8 = vmul.f32 -1.442695, %v1068_v6  ;;  %v1063_v9 = vadd.f32 %v2670_v35, %v1062_v7 }
 0x39d   :  { %v1969_v10 = vpop.f32.mrf.mxu1 }
 0x39e   :  { %2212 = vpow2.f32 %v1469_v8  ;;  %v1468_v11 = vmul.f32 -1.442695, %v1063_v9  ;;  %v1078_v13 = vadd.f32 %v1969_v10, %v2670_v35 }
 0x39f   :  { %v1072_v14 = vpop.f32.mrf.mxu1 }
 0x3a0   :  { %2214 = vpow2.f32 %v1468_v11  ;;  %v1471_v15 = vmul.f32 -1.442695, %v1078_v13  ;;  %v1073_v16 = vadd.f32 %v2670_v35, %v1072_v14 }
 0x3a1   :  { %v1972_v17 = vpop.f32.mrf.mxu1 }
 0x3a2   :  { %2216 = vpow2.f32 %v1471_v15  ;;  %v1470_v18 = vmul.f32 -1.442695, %v1073_v16  ;;  %v1088_v19 = vadd.f32 %v1972_v17, %v2670_v35 }
 0x3a3   :  { %v1082_v20 = vpop.f32.mrf.mxu1 }
 0x3a4   :  { %2218 = vpow2.f32 %v1470_v18  ;;  %v1473_v21 = vmul.f32 -1.442695, %v1088_v19  ;;  %v1083_v22 = vadd.f32 %v2670_v35, %v1082_v20 }
 0x3a5   :  { %v1975_v23 = vpop.f32.mrf.mxu1 }
 0x3a6   :  { %2220 = vpow2.f32 %v1473_v21  ;;  %v1472_v24 = vmul.f32 -1.442695, %v1083_v22  ;;  %v1098_v25 = vadd.f32 %v1975_v23, %v2670_v35 }
 0x3a7   :  { %v1092_v26 = vpop.f32.mrf.mxu1 }
 0x3a8   :  { %2222 = vpow2.f32 %v1472_v24  ;;  %v1475_v27 = vmul.f32 -1.442695, %v1098_v25  ;;  %v1093_v28 = vadd.f32 %v2670_v35, %v1092_v26 }
 0x3a9   :  { %v1978_v29 = vpop.f32.mrf.mxu1 }
 0x3aa   :  { %2224 = vpow2.f32 %v1475_v27  ;;  %v1474_v30 = vmul.f32 -1.442695, %v1093_v28  ;;  %v1108_v31 = vadd.f32 %v1978_v29, %v2670_v35 }
 0x3ab   :  { %v2213_v61 = vpop.eup %2212  ;;  %v1102_v32 = vpop.f32.mrf.mxu1 }
 0x3ac   :  { %v1318_v33 = vadd.f32 1.0, %v2213_v61  ;;  %2226 = vpow2.f32 %v1474_v30  ;;  %v1477_v34 = vmul.f32 -1.442695, %v1108_v31  ;;  %v1103_v36 = vadd.f32 %v2670_v35, %v1102_v32 }
 0x3ad   :  { %v2215_v37 = vpop.eup %2214  ;;  %v1981_v38 = vpop.f32.mrf.mxu1 }
 0x3ae   :  { %2228 = vrcp.f32 %v1318_v33  ;;  %v1317_v39 = vadd.f32 1.0, %v2215_v37  ;;  %v1476_v40 = vmul.f32 -1.442695, %v1103_v36  ;;  %v1118_v41 = vadd.f32 %v1981_v38, %v2670_v35 }
 0x3af   :  { %v2217_v42 = vpop.eup %2216  ;;  %2230 = vpow2.f32 %v1477_v34  ;;  %v1112_v43 = vpop.f32.mrf.mxu1 }
 0x3b0   :  { %2232 = vrcp.f32 %v1317_v39  ;;  %v1320_v44 = vadd.f32 1.0, %v2217_v42  ;;  %v1479_v45 = vmul.f32 -1.442695, %v1118_v41  ;;  %v1113_v12 = vadd.f32 %v2670_v35, %v1112_v43 }
 0x3b1   :  { %v2219_v46 = vpop.eup %2218  ;;  %2234 = vpow2.f32 %v1476_v40  ;;  %v1984_v47 = vpop.f32.mrf.mxu1 }
 0x3b2   :  { %2236 = vrcp.f32 %v1320_v44  ;;  %v1319_v48 = vadd.f32 1.0, %v2219_v46  ;;  %v1478_v49 = vmul.f32 -1.442695, %v1113_v12  ;;  %v1128_v50 = vadd.f32 %v1984_v47, %v2670_v35 }
 0x3b3   :  { %v2221_v51 = vpop.eup %2220  ;;  %2238 = vpow2.f32 %v1479_v45  ;;  %v1122_v52 = vpop.f32.mrf.mxu1 }
 0x3b4   :  { %2240 = vrcp.f32 %v1319_v48  ;;  %v1322_v53 = vadd.f32 1.0, %v2221_v51  ;;  %v1481_v54 = vmul.f32 -1.442695, %v1128_v50  ;;  %v1123_v55 = vadd.f32 %v2670_v35, %v1122_v52 }
 0x3b5   :  { %v2223_v56 = vpop.eup %2222  ;;  %2242 = vpow2.f32 %v1478_v49  ;;  %v1987_v57 = vpop.f32.mrf.mxu1 }
 0x3b6   :  { %2244 = vrcp.f32 %v1322_v53  ;;  %v1321_v58 = vadd.f32 1.0, %v2223_v56  ;;  %v1480_v59 = vmul.f32 -1.442695, %v1123_v55  ;;  %v1138_v60 = vadd.f32 %v1987_v57, %v2670_v35 }
 0x3b7   :  { %v2225_v62 = vpop.eup %2224  ;;  %2246 = vpow2.f32 %v1481_v54  ;;  %v1132_v63 = vpop.f32.mrf.mxu1 }
 0x3b8   :  { %2248 = vrcp.f32 %v1321_v58  ;;  %v1324_v0 = vadd.f32 1.0, %v2225_v62  ;;  %v1483_v1 = vmul.f32 -1.442695, %v1138_v60  ;;  %v1133_v2 = vadd.f32 %v2670_v35, %v1132_v63 }
 0x3b9   :  { %v2227_v3 = vpop.eup %2226  ;;  %2250 = vpow2.f32 %v1480_v59  ;;  %v1990_v4 = vpop.f32.mrf.mxu1 }
 0x3ba   :  { %2252 = vrcp.f32 %v1324_v0  ;;  %v1323_v5 = vadd.f32 1.0, %v2227_v3  ;;  %v1482_v6 = vmul.f32 -1.442695, %v1133_v2  ;;  %v1148_v7 = vadd.f32 %v1990_v4, %v2670_v35 }
 0x3bb   :  { %v2229_v8 = vpop.eup %2228  ;;  %2254 = vpow2.f32 %v1483_v1  ;;  %v1142_v9 = vpop.f32.mrf.mxu1 }
 0x3bc   :  { %v2231_v10 = vpop.eup %2230  ;;  %1414 = vst [vmem:[#allocation11 + $0x8] sm:$0xff] %v2229_v8  ;;  %2256 = vrcp.f32 %v1323_v5  ;;  %v1485_v11 = vmul.f32 -1.442695, %v1148_v7  ;;  %v1143_v13 = vadd.f32 %v2670_v35, %v1142_v9 }
 0x3bd   :  { %v2233_v14 = vpop.eup %2232  ;;  %v1326_v15 = vadd.f32 1.0, %v2231_v10  ;;  %2258 = vpow2.f32 %v1482_v6  ;;  %v1993_v16 = vpop.f32.mrf.mxu1 }
 0x3be   :  { %v2235_v17 = vpop.eup %2234  ;;  %1413 = vst [vmem:[#allocation11] sm:$0xff] %v2233_v14  ;;  %2260 = vpow2.f32 %v1485_v11  ;;  %v1484_v18 = vmul.f32 -1.442695, %v1143_v13  ;;  %v1158_v19 = vadd.f32 %v1993_v16, %v2670_v35 }
 0x3bf   :  { %v2237_v20 = vpop.eup %2236  ;;  %2262 = vrcp.f32 %v1326_v15  ;;  %v1325_v21 = vadd.f32 1.0, %v2235_v17  ;;  %v1152_v22 = vpop.f32.mrf.mxu1 }
 0x3c0   :  { %v2239_v23 = vpop.eup %2238  ;;  %1416 = vst [vmem:[#allocation11 + $0x18] sm:$0xff] %v2237_v20  ;;  %2264 = vpow2.f32 %v1484_v18  ;;  %v1487_v24 = vmul.f32 -1.442695, %v1158_v19  ;;  %v1153_v25 = vadd.f32 %v2670_v35, %v1152_v22 }
 0x3c1   :  { %v2241_v26 = vpop.eup %2240  ;;  %2266 = vrcp.f32 %v1325_v21  ;;  %v1328_v27 = vadd.f32 1.0, %v2239_v23  ;;  %v1996_v28 = vpop.f32.mrf.mxu1 }
 0x3c2   :  { %v2243_v29 = vpop.eup %2242  ;;  %1415 = vst [vmem:[#allocation11 + $0x10] sm:$0xff] %v2241_v26  ;;  %2268 = vpow2.f32 %v1487_v24  ;;  %v1486_v30 = vmul.f32 -1.442695, %v1153_v25  ;;  %v1168_v31 = vadd.f32 %v1996_v28, %v2670_v35 }
 0x3c3   :  { %v2245_v61 = vpop.eup %2244  ;;  %2270 = vrcp.f32 %v1328_v27  ;;  %v1327_v32 = vadd.f32 1.0, %v2243_v29  ;;  %v1162_v33 = vpop.f32.mrf.mxu1 }
 0x3c4   :  { %v2247_v34 = vpop.eup %2246  ;;  %1418 = vst [vmem:[#allocation11 + $0x28] sm:$0xff] %v2245_v61  ;;  %2272 = vpow2.f32 %v1486_v30  ;;  %v1489_v36 = vmul.f32 -1.442695, %v1168_v31  ;;  %v1163_v37 = vadd.f32 %v2670_v35, %v1162_v33 }
 0x3c5   :  { %v2249_v38 = vpop.eup %2248  ;;  %2274 = vrcp.f32 %v1327_v32  ;;  %v1330_v39 = vadd.f32 1.0, %v2247_v34  ;;  %v1999_v40 = vpop.f32.mrf.mxu1 }
 0x3c6   :  { %v2251_v41 = vpop.eup %2250  ;;  %1417 = vst [vmem:[#allocation11 + $0x20] sm:$0xff] %v2249_v38  ;;  %2276 = vpow2.f32 %v1489_v36  ;;  %v1488_v42 = vmul.f32 -1.442695, %v1163_v37  ;;  %v1178_v43 = vadd.f32 %v1999_v40, %v2670_v35 }
 0x3c7   :  { %v2253_v44 = vpop.eup %2252  ;;  %2278 = vrcp.f32 %v1330_v39  ;;  %v1329_v45 = vadd.f32 1.0, %v2251_v41  ;;  %v1172_v12 = vpop.f32.mrf.mxu1 }
 0x3c8   :  { %v2255_v46 = vpop.eup %2254  ;;  %1420 = vst [vmem:[#allocation11 + $0x38] sm:$0xff] %v2253_v44  ;;  %2280 = vpow2.f32 %v1488_v42  ;;  %v1491_v47 = vmul.f32 -1.442695, %v1178_v43  ;;  %v1173_v48 = vadd.f32 %v2670_v35, %v1172_v12 }
 0x3c9   :  { %v2257_v49 = vpop.eup %2256  ;;  %2282 = vrcp.f32 %v1329_v45  ;;  %v1332_v50 = vadd.f32 1.0, %v2255_v46  ;;  %v2002_v51 = vpop.f32.mrf.mxu1 }
 0x3ca   :  { %v2259_v52 = vpop.eup %2258  ;;  %1419 = vst [vmem:[#allocation11 + $0x30] sm:$0xff] %v2257_v49  ;;  %2284 = vpow2.f32 %v1491_v47  ;;  %v1490_v53 = vmul.f32 -1.442695, %v1173_v48  ;;  %v1188_v54 = vadd.f32 %v2002_v51, %v2670_v35 }
 0x3cb   :  { %v2261_v55 = vpop.eup %2260  ;;  %2286 = vrcp.f32 %v1332_v50  ;;  %v1331_v56 = vadd.f32 1.0, %v2259_v52  ;;  %v1182_v57 = vpop.f32.mrf.mxu1 }
 0x3cc   :  { %v2263_v58 = vpop.eup %2262  ;;  %v1334_v59 = vadd.f32 1.0, %v2261_v55  ;;  %2288 = vpow2.f32 %v1490_v53  ;;  %v1493_v60 = vmul.f32 -1.442695, %v1188_v54  ;;  %v1183_v62 = vadd.f32 %v2670_v35, %v1182_v57 }
 0x3cd   :  { %v2265_v63 = vpop.eup %2264  ;;  %1422 = vst [vmem:[#allocation11 + $0x48] sm:$0xff] %v2263_v58  ;;  %2290 = vrcp.f32 %v1331_v56  ;;  %v2005_v0 = vpop.f32.mrf.mxu1 }
 0x3ce   :  { %v2267_v1 = vpop.eup %2266  ;;  %2292 = vrcp.f32 %v1334_v59  ;;  %v1333_v2 = vadd.f32 1.0, %v2265_v63  ;;  %v1492_v3 = vmul.f32 -1.442695, %v1183_v62  ;;  %v1198_v4 = vadd.f32 %v2005_v0, %v2670_v35 }
 0x3cf   :  { %v2269_v5 = vpop.eup %2268  ;;  %1421 = vst [vmem:[#allocation11 + $0x40] sm:$0xff] %v2267_v1  ;;  %2294 = vpow2.f32 %v1493_v60  ;;  %v1192_v6 = vpop.f32.mrf.mxu1 }
 0x3d0   :  { %v2271_v7 = vpop.eup %2270  ;;  %2296 = vrcp.f32 %v1333_v2  ;;  %v1336_v8 = vadd.f32 1.0, %v2269_v5  ;;  %v1495_v9 = vmul.f32 -1.442695, %v1198_v4  ;;  %v1193_v10 = vadd.f32 %v2670_v35, %v1192_v6 }
 0x3d1   :  { %v2273_v11 = vpop.eup %2272  ;;  %1424 = vst [vmem:[#allocation11 + $0x58] sm:$0xff] %v2271_v7  ;;  %2298 = vpow2.f32 %v1492_v3  ;;  %v2008_v13 = vpop.f32.mrf.mxu1 }
 0x3d2   :  { %v2275_v14 = vpop.eup %2274  ;;  %2300 = vrcp.f32 %v1336_v8  ;;  %v1335_v15 = vadd.f32 1.0, %v2273_v11  ;;  %v1494_v16 = vmul.f32 -1.442695, %v1193_v10  ;;  %v1208_v17 = vadd.f32 %v2008_v13, %v2670_v35 }
 0x3d3   :  { %v2277_v18 = vpop.eup %2276  ;;  %1423 = vst [vmem:[#allocation11 + $0x50] sm:$0xff] %v2275_v14  ;;  %2302 = vpow2.f32 %v1495_v9  ;;  %v1202_v19 = vpop.f32.mrf.mxu1 }
 0x3d4   :  { %v2279_v20 = vpop.eup %2278  ;;  %2304 = vrcp.f32 %v1335_v15  ;;  %v1338_v21 = vadd.f32 1.0, %v2277_v18  ;;  %v1497_v22 = vmul.f32 -1.442695, %v1208_v17  ;;  %v1203_v23 = vadd.f32 %v2670_v35, %v1202_v19 }
 0x3d5   :  { %v2281_v24 = vpop.eup %2280  ;;  %1426 = vst [vmem:[#allocation11 + $0x68] sm:$0xff] %v2279_v20  ;;  %2306 = vpow2.f32 %v1494_v16  ;;  %v2011_v25 = vpop.f32.mrf.mxu1 }
 0x3d6   :  { %v2283_v26 = vpop.eup %2282  ;;  %2308 = vrcp.f32 %v1338_v21  ;;  %v1337_v27 = vadd.f32 1.0, %v2281_v24  ;;  %v1496_v28 = vmul.f32 -1.442695, %v1203_v23  ;;  %v1218_v29 = vadd.f32 %v2011_v25, %v2670_v35 }
 0x3d7   :  { %v2285_v30 = vpop.eup %2284  ;;  %1425 = vst [vmem:[#allocation11 + $0x60] sm:$0xff] %v2283_v26  ;;  %2310 = vpow2.f32 %v1497_v22  ;;  %v1212_v31 = vpop.f32.mrf.mxu1 }
 0x3d8   :  { %v2287_v61 = vpop.eup %2286  ;;  %2312 = vrcp.f32 %v1337_v27  ;;  %v1340_v32 = vadd.f32 1.0, %v2285_v30  ;;  %v1499_v33 = vmul.f32 -1.442695, %v1218_v29  ;;  %v1213_v34 = vadd.f32 %v2670_v35, %v1212_v31 }
 0x3d9   :  { %v2289_v36 = vpop.eup %2288  ;;  %1428 = vst [vmem:[#allocation11 + $0x78] sm:$0xff] %v2287_v61  ;;  %2314 = vpow2.f32 %v1496_v28 }
 0x3da   :  { %v2291_v37 = vpop.eup %2290  ;;  %2316 = vrcp.f32 %v1340_v32  ;;  %v1339_v38 = vadd.f32 1.0, %v2289_v36  ;;  %v1498_v39 = vmul.f32 -1.442695, %v1213_v34 }
 0x3db   :  { %v2293_v40 = vpop.eup %2292  ;;  %1427 = vst [vmem:[#allocation11 + $0x70] sm:$0xff] %v2291_v37  ;;  %2318 = vpow2.f32 %v1499_v33 }
 0x3dc   :  { %v2295_v41 = vpop.eup %2294  ;;  %1430 = vst [vmem:[#allocation11 + $0x88] sm:$0xff] %v2293_v40  ;;  %2320 = vrcp.f32 %v1339_v38 }
 0x3dd   :  { %v2297_v42 = vpop.eup %2296  ;;  %v1342_v43 = vadd.f32 1.0, %v2295_v41  ;;  %2322 = vpow2.f32 %v1498_v39 }
 0x3de   :  { %v2299_v44 = vpop.eup %2298  ;;  %1429 = vst [vmem:[#allocation11 + $0x80] sm:$0xff] %v2297_v42 }
 0x3df   :  { %v2301_v45 = vpop.eup %2300  ;;  %2324 = vrcp.f32 %v1342_v43  ;;  %v1341_v35 = vadd.f32 1.0, %v2299_v44 }
 0x3e0   :  { %v2303_v12 = vpop.eup %2302  ;;  %1432 = vst [vmem:[#allocation11 + $0x98] sm:$0xff] %v2301_v45 }
 0x3e1   :  { %v2305_v46 = vpop.eup %2304  ;;  %2326 = vrcp.f32 %v1341_v35  ;;  %v1344_v47 = vadd.f32 1.0, %v2303_v12 }
 0x3e2   :  { %v2307_v48 = vpop.eup %2306  ;;  %1431 = vst [vmem:[#allocation11 + $0x90] sm:$0xff] %v2305_v46 }
 0x3e3   :  { %v2309_v49 = vpop.eup %2308  ;;  %2328 = vrcp.f32 %v1344_v47  ;;  %v1343_v50 = vadd.f32 1.0, %v2307_v48 }
 0x3e4   :  { %v2311_v51 = vpop.eup %2310  ;;  %1434 = vst [vmem:[#allocation11 + $0xa8] sm:$0xff] %v2309_v49 }
 0x3e5   :  { %v2313_v52 = vpop.eup %2312  ;;  %2330 = vrcp.f32 %v1343_v50  ;;  %v1346_v53 = vadd.f32 1.0, %v2311_v51 }
 0x3e6   :  { %v2315_v54 = vpop.eup %2314  ;;  %1433 = vst [vmem:[#allocation11 + $0xa0] sm:$0xff] %v2313_v52 }
 0x3e7   :  { %v2317_v55 = vpop.eup %2316  ;;  %2332 = vrcp.f32 %v1346_v53  ;;  %v1345_v56 = vadd.f32 1.0, %v2315_v54 }
 0x3e8   :  { %v2319_v57 = vpop.eup %2318  ;;  %1436 = vst [vmem:[#allocation11 + $0xb8] sm:$0xff] %v2317_v55 }
 0x3e9   :  { %v2321_v58 = vpop.eup %2320  ;;  %2334 = vrcp.f32 %v1345_v56  ;;  %v1348_v59 = vadd.f32 1.0, %v2319_v57 }
 0x3ea   :  { %v2323_v60 = vpop.eup %2322  ;;  %1435 = vst [vmem:[#allocation11 + $0xb0] sm:$0xff] %v2321_v58 }
 0x3eb   :  { %2336 = vrcp.f32 %v1348_v59  ;;  %v1347_v62 = vadd.f32 1.0, %v2323_v60 }
 0x3ec   :  { %v2325_v63 = vpop.eup %2324 }
 0x3ed   :  { %1438 = vst [vmem:[#allocation11 + $0xc8] sm:$0xff] %v2325_v63  ;;  %2338 = vrcp.f32 %v1347_v62 }
 0x3ee   :  { %v2327_v0 = vpop.eup %2326 }
 0x3ef   :  { %1437 = vst [vmem:[#allocation11 + $0xc0] sm:$0xff] %v2327_v0 }
 0x3f0   :  { %v2329_v1 = vpop.eup %2328 }
 0x3f1   :  { %1440 = vst [vmem:[#allocation11 + $0xd8] sm:$0xff] %v2329_v1 }
 0x3f2   :  { %v2331_v2 = vpop.eup %2330 }
 0x3f3   :  { %1439 = vst [vmem:[#allocation11 + $0xd0] sm:$0xff] %v2331_v2 }
 0x3f4   :  { %v2333_v3 = vpop.eup %2332 }
 0x3f5   :  { %1442 = vst [vmem:[#allocation11 + $0xe8] sm:$0xff] %v2333_v3 }
 0x3f6   :  { %v2335_v4 = vpop.eup %2334 }
 0x3f7   :  { %1441 = vst [vmem:[#allocation11 + $0xe0] sm:$0xff] %v2335_v4 }
 0x3f8   :  { %v2337_v5 = vpop.eup %2336 }
 0x3f9   :  { %1444 = vst [vmem:[#allocation11 + $0xf8] sm:$0xff] %v2337_v5 }
 0x3fa   :  { %v2339_v6 = vpop.eup %2338 }
 0x3fb   :  { %1443 = vst [vmem:[#allocation11 + $0xf0] sm:$0xff] %v2339_v6 }
 0x3fc   :  { %2451 = shalt.err (!%p2448_p1)
}
 0x3fd   :  { %1456 = dma.vmem_to_hbm [thread:$0]  %s1451_s17, 4096, %s2719_s9, [#allocation4], %s2470_s14, %s2470_s14, %s2471_s15  }
 0x3fe   :  { %2466 = dma.done.wait [#allocation4], 4096  }
 0x3ff   :  { %2467 = vsyncadd [#allocation4], 4294963200 }
 0x400   :  { %1460 = vsyncpa [#allocation3], 1 }
 0x401   :  { %1461 = vsyncpa [#allocation6], 1 }
 0x402   :  { %1462 = vsyncpa [#allocation9], 1 }
 0x403   :  { %1463 = vsyncpa [#allocation4], 1 }

</bundles_post_ra>
